<compile_context>
chip_gen: v7x
topology: tpu7x:2x2x1
jax: 0.10.0
libtpu: 0.0.40
codegen_flags: <defaults>
</compile_context>

<pallas_src>
import jax
import jax.numpy as jnp
from jax.experimental import pallas as pl
from jax.experimental.pallas import tpu as pltpu

LANE = 128
_NEG = -1e9  # bias for padded class columns -> they vanish in log_softmax


def _round_up(a, b):
    return ((a + b - 1) // b) * b


def _vmem_budget_bytes():
    """Generation-aware VMEM budget, leaving pipeline/compiler headroom."""
    cap = 64 * 1024 * 1024  # conservative default (v7x per-TC capacity)
    try:
        cap = int(getattr(pltpu.get_tpu_info(), "vmem_capacity_bytes", cap))
    except Exception:
        pass
    # ~48 MiB on v7x (64 MiB physical), capped at ~96-100 MiB on v5e/v6e (128 MiB).
    return int(min(cap * 3 // 4, 100 * 1024 * 1024))


def _log_softmax_f32(logits):
    m = jnp.max(logits, axis=1, keepdims=True)
    z = logits - m
    lse = jnp.log(jnp.sum(jnp.exp(z), axis=1, keepdims=True))
    return z - lse


# ---------------------------------------------------------------------------
# Fused path: S, h0 VMEM-resident; h1 in VMEM scratch; both hops in one call.
# grid = (2, R): axis 0 = hop (must run in order), axis 1 = row tile.
# ---------------------------------------------------------------------------
def _fused_kernel(s_ref, h0_ref, b_ref, o_ref, h1_ref):
    hop = pl.program_id(0)
    i = pl.program_id(1)
    tm = o_ref.shape[0]
    row = pl.multiple_of(i * tm, tm)
    s_rows = s_ref[pl.ds(row, tm), :]                       # (tm, n_pad) bf16

    @pl.when(hop == 0)
    def _():  # h1 rows = S_rows @ h0   (f32 accumulate, stored bf16)
        h1_ref[pl.ds(row, tm), :] = jnp.dot(
            s_rows, h0_ref[...],
            preferred_element_type=jnp.float32).astype(h1_ref.dtype)

    @pl.when(hop == 1)
    def _():  # out rows = log_softmax(S_rows @ h1 + b)
        logits = jnp.dot(s_rows, h1_ref[...],
                         preferred_element_type=jnp.float32) + b_ref[...]
        o_ref[...] = _log_softmax_f32(logits).astype(o_ref.dtype)
    # (o_ref is intentionally untouched during hop 0; its final HBM contents
    #  come from the hop-1 revisit of the same output block.)


def _propagate_fused(S, H0, bias, *, tm, vmem_limit):
    n_pad = S.shape[0]
    c_pad = H0.shape[1]
    grid = (2, n_pad // tm)

    s_spec = pl.BlockSpec((n_pad, n_pad), lambda h, i: (0, 0))   # resident, read once
    h0_spec = pl.BlockSpec((n_pad, c_pad), lambda h, i: (0, 0))  # resident
    b_spec = pl.BlockSpec((1, c_pad), lambda h, i: (0, 0))
    out_spec = pl.BlockSpec((tm, c_pad), lambda h, i: (i, 0))

    return pl.pallas_call(
        _fused_kernel,
        out_shape=jax.ShapeDtypeStruct((n_pad, c_pad), jnp.float32),
        grid_spec=pltpu.PrefetchScalarGridSpec(
            num_scalar_prefetch=0,
            grid=grid,
            in_specs=[s_spec, h0_spec, b_spec],
            out_specs=out_spec,
            scratch_shapes=[pltpu.VMEM((n_pad, c_pad), jnp.bfloat16)]),
        compiler_params=pltpu.CompilerParams(
            # hop 1 needs ALL hop-0 row tiles -> keep ordered on one core.
            dimension_semantics=("arbitrary", "arbitrary"),
            vmem_limit_bytes=vmem_limit),
        cost_estimate=pl.CostEstimate(
            flops=4 * n_pad * n_pad * c_pad,
            transcendentals=n_pad * c_pad,
            bytes_accessed=(n_pad * n_pad * 2 + n_pad * c_pad * 2
                            + 2 * n_pad * c_pad * 4)),
    )(S, H0, bias)


# ---------------------------------------------------------------------------
# Streamed path (S too big for VMEM): two calls, S streamed as (tm, n_pad)
# row slabs ("parallel" -> v7x megacore), H fully VMEM-resident.
# ---------------------------------------------------------------------------
def _prop_kernel(s_ref, h_ref, o_ref):
    o_ref[...] = jnp.dot(s_ref[...], h_ref[...],
                         preferred_element_type=jnp.float32).astype(o_ref.dtype)


def _prop_lsm_kernel(s_ref, h_ref, b_ref, o_ref):
    logits = jnp.dot(s_ref[...], h_ref[...],
                     preferred_element_type=jnp.float32) + b_ref[...]
    o_ref[...] = _log_softmax_f32(logits).astype(o_ref.dtype)


def _propagate_streamed(S, H, *, tm, vmem_limit, bias=None):
    n_pad = S.shape[0]
    c_pad = H.shape[1]
    grid = (n_pad // tm,)

    s_spec = pl.BlockSpec((tm, n_pad), lambda i: (i, 0))       # streamed row slab
    h_spec = pl.BlockSpec((n_pad, c_pad), lambda i: (0, 0))    # VMEM-resident
    out_spec = pl.BlockSpec((tm, c_pad), lambda i: (i, 0))
    params = pltpu.CompilerParams(
        dimension_semantics=("parallel",),                     # >=2 row tiles -> v7x
        vmem_limit_bytes=vmem_limit)

    flops = 2 * n_pad * n_pad * c_pad
    bytes_s = n_pad * n_pad * S.dtype.itemsize
    bytes_h = n_pad * c_pad * H.dtype.itemsize                 # read once (resident)

    if bias is None:
        return pl.pallas_call(
            _prop_kernel,
            out_shape=jax.ShapeDtypeStruct((n_pad, c_pad), jnp.bfloat16),
            grid_spec=pltpu.PrefetchScalarGridSpec(
                num_scalar_prefetch=0, grid=grid,
                in_specs=[s_spec, h_spec], out_specs=out_spec),
            compiler_params=params,
            cost_estimate=pl.CostEstimate(
                flops=flops, transcendentals=0,
                bytes_accessed=bytes_s + bytes_h + n_pad * c_pad * 2),
        )(S, H)

    b_spec = pl.BlockSpec((1, c_pad), lambda i: (0, 0))
    return pl.pallas_call(
        _prop_lsm_kernel,
        out_shape=jax.ShapeDtypeStruct((n_pad, c_pad), jnp.float32),
        grid_spec=pltpu.PrefetchScalarGridSpec(
            num_scalar_prefetch=0, grid=grid,
            in_specs=[s_spec, h_spec, b_spec], out_specs=out_spec),
        compiler_params=params,
        cost_estimate=pl.CostEstimate(
            flops=flops, transcendentals=n_pad * c_pad,
            bytes_accessed=bytes_s + bytes_h + n_pad * c_pad * 4),
    )(S, H, bias)


# ---------------------------------------------------------------------------
# Forward wrapper
# ---------------------------------------------------------------------------
def sgc_forward(x, edge_index, weight, bias, *, force_path=None):
    """x: [N, F] f32, edge_index: [2, E] i32,
       weight: [C, F] f32 (torch Linear layout), bias: [C] f32.
       force_path: None (auto) | "fused" | "streamed"  (testing hook)."""
    n, _ = x.shape
    c = weight.shape[0]
    c_pad = _round_up(max(c, LANE), LANE)
    budget = _vmem_budget_bytes()

    # ---- path + padding selection ------------------------------------------
    n128 = _round_up(n, 128)
    fused_tm = next(t for t in (512, 256, 128) if n128 % t == 0)
    # S (x2 pipeline bufs) + h0 (x2) + h1 scratch + out blocks (x2)
    fused_bytes = (4 * n128 * n128 + 4 * n128 * c_pad + 2 * n128 * c_pad
                   + 8 * fused_tm * c_pad)
    if force_path is None:
        use_fused = fused_bytes <= budget
    else:
        use_fused = (force_path == "fused")

    if use_fused:
        n_pad, tm = n128, fused_tm
    else:
        # Streamed path only triggers for large N, where a 512 pad is <~10%
        # waste and lets tm in {512, 256, 128} always divide n_pad.
        n_pad = _round_up(n, 512)
        tm = 512
        while tm > 128 and (4 * tm * n_pad + 4 * n_pad * c_pad
                            + 8 * tm * c_pad) > budget:
            tm //= 2

    # ---- glue (plain JAX): gcn_norm, scattered directly at padded shape ----
    src, dst = edge_index[0], edge_index[1]
    loop = jnp.arange(n, dtype=edge_index.dtype)
    src = jnp.concatenate([src, loop])
    dst = jnp.concatenate([dst, loop])
    deg = jnp.zeros((n,), jnp.float32).at[dst].add(1.0)
    dinv = jnp.where(deg > 0, jax.lax.rsqrt(deg), 0.0)
    ew = dinv[dst] * dinv[src]
    # f32 scatter (exact duplicate-edge accumulation), one cast to bf16.
    S_p = jnp.zeros((n_pad, n_pad), jnp.float32).at[dst, src].add(ew)
    S_p = S_p.astype(jnp.bfloat16)
    # TODO(synk): for large sparse graphs keep S in CSR and drive a gather
    # SpMM via PrefetchScalarGridSpec instead of densifying O(N^2).

    # ---- reassociate: (S S X) W^T + b == S (S (X W^T)) + b -----------------
    xw = x @ weight.T                                    # [N, C] tiny, plain JAX
    h0 = jnp.zeros((n_pad, c_pad), jnp.bfloat16).at[:n, :c].set(
        xw.astype(jnp.bfloat16))
    b_p = jnp.full((1, c_pad), _NEG, jnp.float32).at[0, :c].set(bias)

    if use_fused:
        out = _propagate_fused(S_p, h0, b_p, tm=tm, vmem_limit=budget)
    else:
        h1 = _propagate_streamed(S_p, h0, tm=tm, vmem_limit=budget)
        out = _propagate_streamed(S_p, h1, tm=tm, vmem_limit=budget, bias=b_p)
    return out[:n, :c]


if __name__ == "__main__":
    key = jax.random.PRNGKey(0)
    k_x, k_e, k_w, k_b = jax.random.split(key, 4)

    N, F, C, E = 600, 32, 8, 3000   # nodes, num_features, num_classes, edges

    x = jax.random.normal(k_x, (N, F), dtype=jnp.float32)
    edge_index = jax.random.randint(k_e, (2, E), 0, N, dtype=jnp.int32)
    bound = 1.0 / (F ** 0.5)
    weight = jax.random.uniform(k_w, (C, F), jnp.float32, -bound, bound)
    bias = jax.random.uniform(k_b, (C,), jnp.float32, -bound, bound)

    # pure-JAX f32 dense reference
    src, dst = edge_index[0], edge_index[1]
    loop = jnp.arange(N, dtype=jnp.int32)
    src = jnp.concatenate([src, loop])
    dst = jnp.concatenate([dst, loop])
    deg = jnp.zeros((N,), jnp.float32).at[dst].add(1.0)
    dinv = jnp.where(deg > 0, jax.lax.rsqrt(deg), 0.0)
    S_ref = jnp.zeros((N, N), jnp.float32).at[dst, src].add(dinv[dst] * dinv[src])
    logits_ref = S_ref @ (S_ref @ x) @ weight.T + bias
    ref = jax.nn.log_softmax(logits_ref, axis=1)

    # default (auto) path: fused, S VMEM-resident at this size
    out = sgc_forward(x, edge_index, weight, bias)
    jax.block_until_ready(out)
    assert out.shape == (N, C)
    assert jnp.allclose(jnp.sum(jnp.exp(out), axis=1), 1.0, atol=1e-3)
    assert float(jnp.max(jnp.abs(out - ref))) < 0.2

    # also exercise the streamed (large-graph) path on the same inputs
    out_s = sgc_forward(x, edge_index, weight, bias, force_path="streamed")
    jax.block_until_ready(out_s)
    assert out_s.shape == (N, C)
    assert float(jnp.max(jnp.abs(out_s - ref))) < 0.2

    print("KERNEL_OK")
</pallas_src>

<mosaic_0001>
module attributes {stable_mosaic.version = 11 : i64} {
  func.func @_fused_kernel(%arg0: i32, %arg1: i32, %arg2: memref<640x640xbf16, #tpu.memory_space<vmem>>, %arg3: memref<640x128xbf16, #tpu.memory_space<vmem>>, %arg4: memref<1x128xf32, #tpu.memory_space<vmem>>, %arg5: memref<128x128xf32, #tpu.memory_space<vmem>>, %arg6: memref<640x128xbf16, #tpu.memory_space<vmem>>) attributes {dimension_semantics = [#tpu.dimension_semantics<arbitrary>, #tpu.dimension_semantics<arbitrary>], iteration_bounds = array<i64: 2, 5>, scalar_prefetch = 0 : i64, scratch_operands = 1 : i64, tpu.core_type = #tpu.core_type<tc>, window_params = [{pipeline_mode = #tpu.pipeline_mode<synchronous>, transform_indices = @transform_0, window_bounds = array<i64: 640, 640>}, {pipeline_mode = #tpu.pipeline_mode<synchronous>, transform_indices = @transform_1, window_bounds = array<i64: 640, 128>}, {pipeline_mode = #tpu.pipeline_mode<synchronous>, transform_indices = @transform_2, window_bounds = array<i64: 1, 128>}, {transform_indices = @transform_3, window_bounds = array<i64: 128, 128>}]} {
    %c128_i32 = arith.constant 128 : i32
    %0 = arith.muli %arg1, %c128_i32 : i32
    %1 = tpu.assume_multiple %0, 128 : i32
    %2 = arith.index_cast %1 : i32 to index
    %c0 = arith.constant 0 : index
    %3 = vector.load %arg2[%2, %c0] : memref<640x640xbf16, #tpu.memory_space<vmem>>, vector<128x640xbf16>
    %c0_i32 = arith.constant 0 : i32
    %4 = arith.cmpi eq, %arg0, %c0_i32 : i32
    %5 = arith.extui %4 : i1 to i32
    %c0_i32_0 = arith.constant 0 : i32
    %6 = arith.cmpi ne, %5, %c0_i32_0 : i32
    scf.if %6 {
      %c0_2 = arith.constant 0 : index
      %c0_3 = arith.constant 0 : index
      %10 = vector.load %arg3[%c0_2, %c0_3] : memref<640x128xbf16, #tpu.memory_space<vmem>>, vector<640x128xbf16>
      %cst = arith.constant dense<0.000000e+00> : vector<128x128xf32>
      %11 = tpu.matmul %3, %10, %cst {dimension_numbers = #tpu.dot_dimension_numbers<[1], [0], [0], [1], [0, 0, 1, 1], [], []>} : vector<128x640xbf16>, vector<640x128xbf16>, vector<128x128xf32> -> vector<128x128xf32>
      %12 = arith.truncf %11 : vector<128x128xf32> to vector<128x128xbf16>
      %13 = arith.index_cast %1 : i32 to index
      %c0_4 = arith.constant 0 : index
      %14 = vector.load %arg6[%13, %c0_4] : memref<640x128xbf16, #tpu.memory_space<vmem>>, vector<128x128xbf16>
      tpu.vector_store %arg6[%13, %c0_4], %12 {strides = array<i32>} : memref<640x128xbf16, #tpu.memory_space<vmem>>, vector<128x128xbf16>,
    } else {
    }
    %c1_i32 = arith.constant 1 : i32
    %7 = arith.cmpi eq, %arg0, %c1_i32 : i32
    %8 = arith.extui %7 : i1 to i32
    %c0_i32_1 = arith.constant 0 : i32
    %9 = arith.cmpi ne, %8, %c0_i32_1 : i32
    scf.if %9 {
      %c0_2 = arith.constant 0 : index
      %c0_3 = arith.constant 0 : index
      %10 = vector.load %arg6[%c0_2, %c0_3] : memref<640x128xbf16, #tpu.memory_space<vmem>>, vector<640x128xbf16>
      %cst = arith.constant dense<0.000000e+00> : vector<128x128xf32>
      %11 = tpu.matmul %3, %10, %cst {dimension_numbers = #tpu.dot_dimension_numbers<[1], [0], [0], [1], [0, 0, 1, 1], [], []>} : vector<128x640xbf16>, vector<640x128xbf16>, vector<128x128xf32> -> vector<128x128xf32>
      %c0_4 = arith.constant 0 : index
      %c0_5 = arith.constant 0 : index
      %12 = vector.load %arg4[%c0_4, %c0_5] : memref<1x128xf32, #tpu.memory_space<vmem>>, vector<1x128xf32>
      %13 = vector.broadcast %12 : vector<1x128xf32> to vector<128x128xf32>
      %14 = arith.addf %11, %13 : vector<128x128xf32>
      %cst_6 = arith.constant dense<0xFF800000> : vector<128xf32>
      %15 = vector.multi_reduction <maximumf>, %14, %cst_6 [1] : vector<128x128xf32> to vector<128xf32>
      %16 = vector.shape_cast %15 : vector<128xf32> to vector<128x1xf32>
      %17 = vector.broadcast %16 : vector<128x1xf32> to vector<128x128xf32>
      %18 = arith.subf %14, %17 : vector<128x128xf32>
      %19 = math.exp %18 : vector<128x128xf32>
      %cst_7 = arith.constant dense<0.000000e+00> : vector<128xf32>
      %20 = vector.multi_reduction <add>, %19, %cst_7 [1] : vector<128x128xf32> to vector<128xf32>
      %21 = vector.shape_cast %20 : vector<128xf32> to vector<128x1xf32>
      %22 = math.log %21 : vector<128x1xf32>
      %23 = vector.broadcast %22 : vector<128x1xf32> to vector<128x128xf32>
      %24 = arith.subf %18, %23 : vector<128x128xf32>
      %c0_8 = arith.constant 0 : index
      %c0_9 = arith.constant 0 : index
      %25 = vector.load %arg5[%c0_8, %c0_9] : memref<128x128xf32, #tpu.memory_space<vmem>>, vector<128x128xf32>
      tpu.vector_store %arg5[%c0_8, %c0_9], %24 {strides = array<i32>} : memref<128x128xf32, #tpu.memory_space<vmem>>, vector<128x128xf32>,
    } else {
    }
    return
  }
  func.func @transform_0(%arg0: i32, %arg1: i32) -> (i32, i32) {
    %c0_i32 = arith.constant 0 : i32
    %c0_i32_0 = arith.constant 0 : i32
    %c0_i32_1 = arith.constant 0 : i32
    return %c0_i32, %c0_i32_0 : i32, i32
  }
  func.func @transform_1(%arg0: i32, %arg1: i32) -> (i32, i32) {
    %c0_i32 = arith.constant 0 : i32
    %c0_i32_0 = arith.constant 0 : i32
    %c0_i32_1 = arith.constant 0 : i32
    return %c0_i32, %c0_i32_0 : i32, i32
  }
  func.func @transform_2(%arg0: i32, %arg1: i32) -> (i32, i32) {
    %c0_i32 = arith.constant 0 : i32
    %c0_i32_0 = arith.constant 0 : i32
    %c0_i32_1 = arith.constant 0 : i32
    return %c0_i32, %c0_i32_0 : i32, i32
  }
  func.func @transform_3(%arg0: i32, %arg1: i32) -> (i32, i32) {
    %c0_i32 = arith.constant 0 : i32
    %c0_i32_0 = arith.constant 0 : i32
    return %arg1, %c0_i32 : i32, i32
  }
}

</mosaic_0001>

<bundles_post_ra>
// kernel: tpu_custom_call.1
= control target key start
LH: loop header
LB: loop body
LE: loop exit
PB: predicated region body
PF: predicated region fallthrough
CT: control target
= control target key end

     0   :  { %8 = vsyncpa [#allocation4], 0  ;;  %s3534_s0 = inlined_call_operand.hbm [shape: bf16[640,640], index: 0, kind: input, shape index: {}]   ;;  %s3535_s1 = inlined_call_operand.hbm [shape: bf16[640,128], index: 1, kind: input, shape index: {}]   ;;  %s3536_s2 = inlined_call_operand.vmem [shape: f32[1,128], index: 2, kind: input, shape index: {}]   ;;  %s3537_s3 = inlined_call_operand.hbm [shape: f32[640,128], index: 3, kind: output, shape index: {}]  }
   0x1   :  { %9 = vsyncpa [#allocation7], 0 }
   0x2   :  { %10 = vsyncpa [#allocation5], 0 }
   0x3   :  { %12 = vsyncpa [#allocation5 + $0x1], 0  ;;  %s2834_s12 = smov 0   ;;  %s2836_s13 = smov 0  }
   0x4   :  { %s2838_s14 = smov 0   ;;  %s2840_s15 = smov 0  }
   0x5   :  { %s2842_s16 = smov 0   ;;  %s2844_s17 = smov 0  }
   0x6   :  { %s2846_s18 = smov 0   ;;  %s2848_s19 = smov 0  }
   0x7 LB: > { %s1917_s20 = sadd.s32 4294967295, %s2803_s19   ;;  %s1918_s21 = sadd.s32 4294967294, %s2803_s19   ;;  %s2803_s19 = sphi %s2848_s19, %s18_s19   ;;  %s2799_s18 = sphi %s2846_s18, %s3622_s18   ;;  %s2795_s17 = sphi %s2844_s17, %s3621_s17   ;;  %s2791_s16 = sphi %s2842_s16, %s3620_s16   ;;  %s2787_s15 = sphi %s2840_s15, %s3619_s15   ;;  %s2783_s14 = sphi %s2838_s14, %s3618_s14   ;;  %s2779_s13 = sphi %s2836_s13, %s3617_s13   ;;  %s2775_s12 = sphi %s2834_s12, %s3616_s12  }
   0x8   : > { %s27_s22 = sadd.s32 1, %s2795_s17  ;;  %s30_s23 = sadd.s32 1, %s2799_s18 }
   0x9   : > { %p28_p0 = scmp.ge.s32.totalorder %s27_s22, 5  ;;  %s100_s24 = sadd.s32 1, %s2783_s14 }
   0xa   : > { %p110_p1 = scmp.ne.s32.totalorder %s2783_s14, %s2779_s13  ;;  %p111_p2 = scmp.eq.s32.totalorder %s1917_s20, 9 }
   0xb   : > { %s3624_s22 = smov (%p28_p0, %s27_s22), 0  ;;  %s3626_s23 = smov (!%p28_p0, %s30_s23), %s2799_s18 }
   0xc   : > { %3565 = sst [smem:[#allocation12_spill]] %s3624_s22  ;;  %s97_s25 = ssub.s32 %s2795_s17, %s3624_s22 }
   0xd   : > { %p2886_p3 = por %p111_p2, %p110_p1  ;;  %p32_p4 = scmp.ge.s32.totalorder %s3626_s23, 2 }
   0xe   : > { %p98_p5 = scmp.eq.s32.totalorder %s97_s25, 0  ;;  %p116_p6 = scmp.ne.s32.totalorder %s2779_s13, %s2775_s12 }
   0xf   : > { %s3566_s26 = scalar_select %p2886_p3, 1, 0 }
  0x10   : > { %p117_p7 = scmp.eq.s32.totalorder %s1918_s21, 9  ;;  %s3628_s23 = smov (%p32_p4, %s3626_s23), 0 }
  0x11   : > { %3567 = sst [smem:[#allocation13_spill]] %s3628_s23  ;;  %p1919_p9 = scmp.ge.s32.totalorder %s2803_s19, 1 }
  0x12   : > { %s2895_s27 = scalar_select %p98_p5, %s2783_s14, %s100_s24  }
  0x13   : > { %p2897_p8 = por %p117_p7, %p116_p6  ;;  %p124_p10 = scmp.lt.s32.totalorder %s2803_s19, 11 }
  0x14   : > { %p2903_p11 = scmp.eq.s32.totalorder %s1917_s20, 0  ;;  %s2805_s4 = smov [#allocation3]  }
  0x15   : > { %s3568_s28 = scalar_select %p2897_p8, 1, 0 }
  0x16   : > { %s3569_s29 = scalar_select %p2903_p11, 1, 0 }
  0x17   : > { %p2907_p12 = pnand %p1919_p9, %p124_p10  ;;  %s136_s5 = sshll.u32 %s2805_s4, 4  ;;  %s137_s5 = int_to_ptr.vmem [resolvable:$true] %s136_s5 }
  0x18   : > { %s2806_s7 = smov [#allocation6]   ;;  %s2645_s11 = scalar_lea.hbm %s3534_s0, 25600 }
  0x19   : > { %s3570_s30 = scalar_select %p2907_p12, 1, 0 }
  0x1a   : > { %p2453_p13 = pneg %p2907_p12  ;;  %s149_s8 = sshll.u32 %s2806_s7, 4  ;;  %s2919_s8 = int_to_ptr.vmem [resolvable:$true] %s149_s8 }
  0x1b   : > { %p2646_p1 = scmp.ne.s32.totalorder %s3534_s0, %s2645_s11  ;;  %p2652_p6 = scmp.lt.u32.totalorder %s2645_s11, %s3534_s0 }
  0x1c   : > { %p2915_p0 = pnand %p2903_p11, %p2453_p13 }
  0x1e   : > { %p2647_p2 = pneg %p2915_p0 }
  0x20   : > { %p2648_p4 = pnand %p2647_p2, %p2646_p1 }
  0x22   : > { %p2649_p5 = pneg %p2648_p4 }
  0x24   : > { %p2654_p7 = pnand %p2652_p6, %p2649_p5 }
  0x26   : > { %2657 = shalt.err (!%p2654_p7)
}
  0x27   : > { %s2658_s4 = scalar_lea.vmem %s137_s5, 25600  ;;  %p2666_p8 = scmp.lt.s32.totalorder %s137_s5, %s137_s5 }
  0x28   : > { %p2659_p9 = scmp.ne.s32.totalorder %s137_s5, %s2658_s4  ;;  %p2667_p3 = scmp.lt.s32.totalorder %s2658_s4, %s2658_s4 }
  0x2a   : > { %p2661_p10 = pnand %p2659_p9, %p2647_p2  ;;  %p2668_p11 = por %p2667_p3, %p2666_p8 }
  0x2c   : > { %p2662_p13 = pneg %p2661_p10 }
  0x2e   : > { %p2669_p12 = pnand %p2668_p11, %p2662_p13 }
  0x30   : > { %2672 = shalt.err (!%p2669_p12)
}
  0x31   : > { %s2807_s7 = smov 320   ;;  %s2808_s9 = smov 20  }
  0x32   : > { %2456 = dma.hbm_to_vmem [thread:$0]  (!%p2915_p0), %s3534_s0, 25600, %s137_s5, [#allocation4], %s2807_s7, %s2807_s7, %s2808_s9  }
  0x33   : > { %s2673_s24 = scalar_lea.hbm %s3535_s1, 5120 }
  0x34   : > { %p2674_p1 = scmp.ne.s32.totalorder %s3535_s1, %s2673_s24  ;;  %p2680_p11 = scmp.lt.u32.totalorder %s2673_s24, %s3535_s1 }
  0x36   : > { %p2676_p3 = pnand %p2674_p1, %p2647_p2 }
  0x38   : > { %p2677_p8 = pneg %p2676_p3 }
  0x3a   : > { %p2682_p12 = pnand %p2680_p11, %p2677_p8 }
  0x3c   : > { %2685 = shalt.err (!%p2682_p12)
}
  0x3d   : > { %s2686_s5 = scalar_lea.vmem %s2919_s8, 5120  ;;  %p2694_p7 = scmp.lt.s32.totalorder %s2919_s8, %s2919_s8 }
  0x3e   : > { %p2687_p4 = scmp.ne.s32.totalorder %s2919_s8, %s2686_s5  ;;  %p2695_p9 = scmp.lt.s32.totalorder %s2686_s5, %s2686_s5 }
  0x40   : > { %p2689_p5 = pnand %p2687_p4, %p2647_p2  ;;  %p2696_p10 = por %p2695_p9, %p2694_p7 }
  0x42   : > { %p2690_p6 = pneg %p2689_p5 }
  0x44   : > { %p2697_p13 = pnand %p2696_p10, %p2690_p6 }
  0x46   : > { %2700 = shalt.err (!%p2697_p13)
}
  0x47   : > { %s2809_s22 = smov 64   ;;  %s2810_s23 = smov 4  }
  0x48   : > { %2459 = dma.hbm_to_vmem [thread:$0]  (!%p2915_p0), %s3535_s1, 5120, %s2919_s8, [#allocation7], %s2809_s22, %s2809_s22, %s2810_s23  }
  0x49   : > { %p3572_p1 = scmp.ne.s32.totalorder %s3570_s30, 0 }
  0x4b   : > { %168 = sbr.rel (%p3572_p1) target bundleno = 1126 (0x466), region = 32 }
  0x52   : > { %p3573_p2 = scmp.ne.s32.totalorder %s3569_s29, 0 }
  0x54   : > { %2762 = dma.done.wait (%p3573_p2), [#allocation4], 25600  }
  0x55   : > { %2764 = vsyncadd (%p3573_p2), [#allocation4], 4294941696 }
  0x56   : > { %2766 = dma.done.wait (%p3573_p2), [#allocation7], 5120  }
  0x57   : > { %2768 = vsyncadd (%p3573_p2), [#allocation7], 4294962176  ;;  %s1926_s6 = sshll.u32 %s2787_s15, 7  ;;  %s188_s8 = sand.u32 1, %s2779_s13  }
  0x58   : > { %s194_s30 = sshra.s32 %s1926_s6, 3  ;;  %s2984_s10 = sshll.u32 %s188_s8, 7 }
  0x59   : > { %s2057_s11 = smul.u32 20, %s194_s30  ;;  %s3133_s29 = scalar_lea.vmem [#allocation8], %s2984_s10 }
  0x5a   : > { %p1928_p0 = scmp.ne.s32.totalorder %s2791_s16, 0 }
  0x5b   : > { %s2986_s20 = scalar_lea.vmem [#allocation3], %s2057_s11  ;;  %v2541_v48 = vld [vmem:[#allocation6 + $0x40] sm:$0xff] (!%p1928_p0)   ;;  %v2545_v54 = vld [vmem:[#allocation6 + $0x48] sm:$0xff] (!%p1928_p0)   ;;  %v2549_v58 = vld [vmem:[#allocation6 + $0x50] sm:$0xff] (!%p1928_p0)   ;;  %s1078_s21 = sshra.s32 (!%p1928_p0), %s1926_s6, 4 }
  0x5c   : > { %v2989_v0 = vld [vmem:[%s2986_s20] sm:$0xff]  ;;  %v2992_v1 = vld [vmem:[%s2986_s20 + $0x8] sm:$0xff]  ;;  %v2995_v2 = vld [vmem:[%s2986_s20 + $0x10] sm:$0xf]  ;;  %2059 = vmatprep.subr.bf16.mxu0 (!%p1928_p0), %v2541_v48  ;;  %s2009_s24 = sshll.u32 (!%p1928_p0), %s1078_s21, 3 }
  0x5d   : > { %3574 = vst [vmem:[#allocation14_spill] sm:$0xff] %v2995_v2  ;;  %v2998_v3 = vld [vmem:[%s2986_s20 + $0x14] sm:$0xff]  ;;  %v3001_v4 = vld [vmem:[%s2986_s20 + $0x1c] sm:$0xff]  ;;  %v3004_v5 = vld [vmem:[%s2986_s20 + $0x24] sm:$0xf]  ;;  %s1081_s25 = scalar_lea.vmem (!%p1928_p0), [#allocation2], %s2009_s24 }
  0x5e   : > { %3575 = vst [vmem:[#allocation15_spill] sm:$0xff] %v3004_v5  ;;  %v3007_v6 = vld [vmem:[%s2986_s20 + $0x28] sm:$0xff]  ;;  %v3010_v7 = vld [vmem:[%s2986_s20 + $0x30] sm:$0xff]  ;;  %v3013_v8 = vld [vmem:[%s2986_s20 + $0x38] sm:$0xf]  ;;  %v1930_v49 = vcombine.high (!%p1928_p0), %v2989_v0, %v2998_v3  ;;  %v1932_v50 = vcombine.high (!%p1928_p0), %v2992_v1, %v3001_v4 }
  0x5f   : > { %3576 = vst [vmem:[#allocation16_spill] sm:$0xff] %v3013_v8  ;;  %v3016_v9 = vld [vmem:[%s2986_s20 + $0x3c] sm:$0xff]  ;;  %v3019_v10 = vld [vmem:[%s2986_s20 + $0x44] sm:$0xff]  ;;  %v3022_v11 = vld [vmem:[%s2986_s20 + $0x4c] sm:$0xf] }
  0x60   : > { %3577 = vst [vmem:[#allocation17_spill] sm:$0xff] %v3022_v11  ;;  %v3025_v12 = vld [vmem:[%s2986_s20 + $0x50] sm:$0xff]  ;;  %v3028_v13 = vld [vmem:[%s2986_s20 + $0x58] sm:$0xff]  ;;  %v3031_v14 = vld [vmem:[%s2986_s20 + $0x60] sm:$0xf]  ;;  %811 = vmatprep.mubr.bf16.mxu0 (!%p1928_p0), %v1930_v49  ;;  %908 = vmatprep.mubr.bf16.mxu1 (!%p1928_p0), %v1932_v50 }
  0x61   : > { %3578 = vst [vmem:[#allocation18_spill] sm:$0xff] %v3031_v14  ;;  %v3034_v15 = vld [vmem:[%s2986_s20 + $0x64] sm:$0xff]  ;;  %v3037_v16 = vld [vmem:[%s2986_s20 + $0x6c] sm:$0xff]  ;;  %v3040_v17 = vld [vmem:[%s2986_s20 + $0x74] sm:$0xf] }
  0x62   : > { %3579 = vst [vmem:[#allocation19_spill] sm:$0xff] %v3040_v17  ;;  %v3043_v18 = vld [vmem:[%s2986_s20 + $0x78] sm:$0xff]  ;;  %v3046_v19 = vld [vmem:[%s2986_s20 + $0x80] sm:$0xff]  ;;  %v3049_v20 = vld [vmem:[%s2986_s20 + $0x88] sm:$0xf] }
  0x63   : > { %3580 = vst [vmem:[#allocation20_spill] sm:$0xff] %v3049_v20  ;;  %v3052_v21 = vld [vmem:[%s2986_s20 + $0x8c] sm:$0xff]  ;;  %v3055_v22 = vld [vmem:[%s2986_s20 + $0x94] sm:$0xff]  ;;  %v3058_v23 = vld [vmem:[%s2986_s20 + $0x9c] sm:$0xf] }
  0x64   : > { %3581 = vst [vmem:[#allocation21_spill] sm:$0xff] %v3058_v23  ;;  %v3061_v24 = vld [vmem:[%s2986_s20 + $0xa0] sm:$0xff]  ;;  %v3064_v25 = vld [vmem:[%s2986_s20 + $0xa8] sm:$0xff]  ;;  %v3067_v26 = vld [vmem:[%s2986_s20 + $0xb0] sm:$0xf] }
  0x65   : > { %3582 = vst [vmem:[#allocation22_spill] sm:$0xff] %v3067_v26  ;;  %v3070_v27 = vld [vmem:[%s2986_s20 + $0xb4] sm:$0xff]  ;;  %v3073_v28 = vld [vmem:[%s2986_s20 + $0xbc] sm:$0xff]  ;;  %v3076_v29 = vld [vmem:[%s2986_s20 + $0xc4] sm:$0xf] }
  0x66   : > { %3583 = vst [vmem:[#allocation23_spill] sm:$0xff] %v3076_v29  ;;  %v3079_v30 = vld [vmem:[%s2986_s20 + $0xc8] sm:$0xff]  ;;  %v3082_v31 = vld [vmem:[%s2986_s20 + $0xd0] sm:$0xff]  ;;  %v3085_v32 = vld [vmem:[%s2986_s20 + $0xd8] sm:$0xf] }
  0x67   : > { %3584 = vst [vmem:[#allocation24_spill] sm:$0xff] %v3085_v32  ;;  %v3088_v33 = vld [vmem:[%s2986_s20 + $0xdc] sm:$0xff]  ;;  %v3091_v34 = vld [vmem:[%s2986_s20 + $0xe4] sm:$0xff]  ;;  %v3094_v35 = vld [vmem:[%s2986_s20 + $0xec] sm:$0xf]  ;;  %250 = sbr.rel (%p1928_p0) target bundleno = 434 (0x1b2), region = 44 }
  0x68   : > { %3585 = vst [vmem:[#allocation25_spill] sm:$0xff] %v3094_v35  ;;  %v3097_v36 = vld [vmem:[%s2986_s20 + $0xf0] sm:$0xff]  ;;  %v3100_v37 = vld [vmem:[%s2986_s20 + $0xf8] sm:$0xff]  ;;  %v3103_v38 = vld [vmem:[%s2986_s20 + $0x100] sm:$0xf] }
  0x69   : > { %3586 = vst [vmem:[#allocation26_spill] sm:$0xff] %v3103_v38  ;;  %v3106_v39 = vld [vmem:[%s2986_s20 + $0x104] sm:$0xff]  ;;  %v3109_v40 = vld [vmem:[%s2986_s20 + $0x10c] sm:$0xff]  ;;  %v3112_v41 = vld [vmem:[%s2986_s20 + $0x114] sm:$0xf] }
  0x6a   : > { %3587 = vst [vmem:[#allocation27_spill] sm:$0xff] %v3112_v41  ;;  %v3115_v42 = vld [vmem:[%s2986_s20 + $0x118] sm:$0xff]  ;;  %v3118_v43 = vld [vmem:[%s2986_s20 + $0x120] sm:$0xff]  ;;  %v3121_v44 = vld [vmem:[%s2986_s20 + $0x128] sm:$0xf] }
  0x6b   : > { %3588 = vst [vmem:[#allocation28_spill] sm:$0xff] %v3115_v42  ;;  %3589 = vst [vmem:[#allocation29_spill] sm:$0xff] %v3118_v43  ;;  %v3124_v45 = vld [vmem:[%s2986_s20 + $0x12c] sm:$0xff]  ;;  %v3127_v46 = vld [vmem:[%s2986_s20 + $0x134] sm:$0xff] }
  0x6c   : > { %3590 = vst [vmem:[#allocation30_spill] sm:$0xff] %v3121_v44  ;;  %3591 = vst [vmem:[#allocation31_spill] sm:$0xff] %v3127_v46  ;;  %v3130_v47 = vld [vmem:[%s2986_s20 + $0x13c] sm:$0xf]  ;;  %v2542_v51 = vld [vmem:[#allocation6 + $0xc0] sm:$0xff] (!%p1928_p0)  }
  0x6d   : > { %3592 = vst [vmem:[#allocation32_spill] sm:$0xff] %v3130_v47  ;;  %v2543_v52 = vld [vmem:[#allocation6] sm:$0xff] (!%p1928_p0)   ;;  %2123 = vmatprep.subr.bf16.mxu1 (!%p1928_p0), %v2542_v51  ;;  %v2546_v55 = vld [vmem:[#allocation6 + $0xc8] sm:$0xff] (!%p1928_p0)   ;;  %v2550_v59 = vld [vmem:[#allocation6 + $0xd0] sm:$0xff] (!%p1928_p0)  }
  0x6e   : > { %v2544_v53 = vld [vmem:[#allocation6 + $0x80] sm:$0xff]   ;;  %2060 = vmatpush3.bf16.msra.mxu0 %v2543_v52  ;;  %v2547_v56 = vld [vmem:[#allocation6 + $0x8] sm:$0xff]   ;;  %v2551_v60 = vld [vmem:[#allocation6 + $0x10] sm:$0xff]  }
  0x6f   : > { %2124 = vmatpush3.bf16.msra.mxu1 %v2544_v53  ;;  %2061 = vmatprep.subr.bf16.mxu0 %v2545_v54  ;;  %v2548_v57 = vld [vmem:[#allocation6 + $0x88] sm:$0xff]   ;;  %v2552_v61 = vld [vmem:[#allocation6 + $0x90] sm:$0xff]   ;;  %v2553_v62 = vld [vmem:[#allocation6 + $0x58] sm:$0xff]  }
  0x70   : > { %2125 = vmatprep.subr.bf16.mxu1 %v2546_v55  ;;  %v2554_v63 = vld [vmem:[#allocation6 + $0xd8] sm:$0xff]   ;;  %v2557_v50 = vld [vmem:[#allocation6 + $0x60] sm:$0xff]   ;;  %v2561_v54 = vld [vmem:[#allocation6 + $0x68] sm:$0xff]  }
  0x71   : > { %v2555_v48 = vld [vmem:[#allocation6 + $0x18] sm:$0xff]   ;;  %v2558_v51 = vld [vmem:[#allocation6 + $0xe0] sm:$0xff]   ;;  %v2562_v55 = vld [vmem:[#allocation6 + $0xe8] sm:$0xff]  }
  0x72   : > { %2062 = vmatpush3.bf16.msra.mxu0 %v2547_v56  ;;  %v2556_v49 = vld [vmem:[#allocation6 + $0x98] sm:$0xff]   ;;  %v2559_v52 = vld [vmem:[#allocation6 + $0x20] sm:$0xff]   ;;  %v2563_v56 = vld [vmem:[#allocation6 + $0x28] sm:$0xff]  }
  0x73   : > { %2126 = vmatpush3.bf16.msra.mxu1 %v2548_v57  ;;  %2063 = vmatprep.subr.bf16.mxu0 %v2549_v58  ;;  %v2560_v53 = vld [vmem:[#allocation6 + $0xa0] sm:$0xff]   ;;  %v2564_v57 = vld [vmem:[#allocation6 + $0xa8] sm:$0xff]   ;;  %v2565_v58 = vld [vmem:[#allocation6 + $0x70] sm:$0xff]  }
  0x74   : > { %2127 = vmatprep.subr.bf16.mxu1 %v2550_v59  ;;  %v2566_v59 = vld [vmem:[#allocation6 + $0xf0] sm:$0xff]  }
  0x76   : > { %2064 = vmatpush3.bf16.msra.mxu0 %v2551_v60  ;;  %v2567_v60 = vld [vmem:[#allocation6 + $0x30] sm:$0xff]  }
  0x77   : > { %2128 = vmatpush3.bf16.msra.mxu1 %v2552_v61  ;;  %2065 = vmatprep.subr.bf16.mxu0 %v2553_v62  ;;  %v2568_v61 = vld [vmem:[#allocation6 + $0xb0] sm:$0xff]   ;;  %v2569_v62 = vld [vmem:[#allocation6 + $0x78] sm:$0xff]  }
  0x78   : > { %2129 = vmatprep.subr.bf16.mxu1 %v2554_v63  ;;  %v2570_v63 = vld [vmem:[#allocation6 + $0xf8] sm:$0xff]  }
  0x7a   : > { %2066 = vmatpush3.bf16.msra.mxu0 %v2555_v48  ;;  %v2571_v48 = vld [vmem:[#allocation6 + $0x38] sm:$0xff]  }
  0x7b   : > { %2130 = vmatpush3.bf16.msra.mxu1 %v2556_v49  ;;  %2067 = vmatprep.subr.bf16.mxu0 %v2557_v50  ;;  %v2572_v49 = vld [vmem:[#allocation6 + $0xb8] sm:$0xff]   ;;  %v1929_v50 = vcombine.low %v2989_v0, %v2998_v3 }
  0x7c   : > { %2131 = vmatprep.subr.bf16.mxu1 %v2558_v51  ;;  %v1931_v51 = vcombine.low %v2992_v1, %v3001_v4 }
  0x7e   : > { %2068 = vmatpush3.bf16.msra.mxu0 %v2559_v52  ;;  %v2573_v52 = vld [vmem:[#allocation6 + $0x100] sm:$0xff]  }
  0x7f   : > { %2132 = vmatpush3.bf16.msra.mxu1 %v2560_v53  ;;  %2069 = vmatprep.subr.bf16.mxu0 %v2561_v54  ;;  %v1935_v53 = vcombine.high %v3007_v6, %v3016_v9  ;;  %v1937_v54 = vcombine.high %v3010_v7, %v3019_v10 }
  0x80   : > { %2133 = vmatprep.subr.bf16.mxu1 %v2562_v55  ;;  %v2574_v55 = vld [vmem:[#allocation6 + $0x108] sm:$0xff]  }
  0x82   : > { %2070 = vmatpush3.bf16.msra.mxu0 %v2563_v56  ;;  %v2575_v56 = vld [vmem:[#allocation6 + $0x110] sm:$0xff]  }
  0x83   : > { %2134 = vmatpush3.bf16.msra.mxu1 %v2564_v57  ;;  %2071 = vmatprep.subr.bf16.mxu0 %v2565_v58  ;;  %v1934_v57 = vcombine.low %v3007_v6, %v3016_v9  ;;  %v1936_v58 = vcombine.low %v3010_v7, %v3019_v10 }
  0x84   : > { %2135 = vmatprep.subr.bf16.mxu1 %v2566_v59  ;;  %v1940_v59 = vcombine.high %v3025_v12, %v3034_v15 }
  0x86   : > { %2072 = vmatpush3.bf16.msra.mxu0 %v2567_v60  ;;  %v1942_v60 = vcombine.high %v3028_v13, %v3037_v16 }
  0x87   : > { %2136 = vmatpush3.bf16.msra.mxu1 %v2568_v61  ;;  %2073 = vmatprep.subr.bf16.mxu0 %v2569_v62  ;;  %v2576_v61 = vld [vmem:[#allocation6 + $0x118] sm:$0xff]   ;;  %v2577_v62 = vld [vmem:[#allocation6 + $0x120] sm:$0xff]  }
  0x88   : > { %2137 = vmatprep.subr.bf16.mxu1 %v2570_v63  ;;  %v1939_v63 = vcombine.low %v3025_v12, %v3034_v15 }
  0x8a   : > { %2074 = vmatpush3.bf16.msra.mxu0 %v2571_v48  ;;  %v1941_v48 = vcombine.low %v3028_v13, %v3037_v16 }
  0x8b   : > { %2138 = vmatpush3.bf16.msra.mxu1 %v2572_v49  ;;  %2347 = vmatprep.subr.bf16.mxu0 %v2573_v52  ;;  %v1945_v49 = vcombine.high %v3043_v18, %v3052_v21 }
  0x8c   : > { %2411 = vmatprep.subr.bf16.mxu1 %v2573_v52 }
  0x8d   : > { %812 = vmatmul.mubr.bf16.vlgmr.msra.gmra.mrb[0].mxu0 %v1929_v50  ;;  %v1947_v50 = vcombine.high %v3046_v19, %v3055_v22 }
  0x8e   : > { %909 = vmatmul.mubr.bf16.vlgmr.msra.gmra.mrb[0].mxu1 %v1931_v51  ;;  %2348 = vmatpush3.bf16.msra.mxu0 %v2573_v52  ;;  %v2578_v51 = vld [vmem:[#allocation6 + $0x128] sm:$0xff]  }
  0x8f   : > { %2419 = vmatpush3.bf16.msra.mxu1 %v2573_v52  ;;  %819 = vmatprep.mubr.bf16.mxu0 %v1935_v53  ;;  %v2579_v52 = vld [vmem:[#allocation6 + $0x130] sm:$0xff]   ;;  %v1944_v53 = vcombine.low %v3043_v18, %v3052_v21 }
  0x90   : > { %916 = vmatprep.mubr.bf16.mxu1 %v1937_v54  ;;  %2349 = vmatprep.subr.bf16.mxu0 %v2574_v55  ;;  %v1946_v54 = vcombine.low %v3046_v19, %v3055_v22 }
  0x91   : > { %2412 = vmatprep.subr.bf16.mxu1 %v2574_v55 }
  0x92   : > { %2350 = vmatpush3.bf16.msra.mxu0 %v2574_v55 }
  0x93   : > { %2420 = vmatpush3.bf16.msra.mxu1 %v2574_v55  ;;  %2351 = vmatprep.subr.bf16.mxu0 %v2575_v56  ;;  %v1950_v55 = vcombine.high %v3061_v24, %v3070_v27 }
  0x94   : > { %2413 = vmatprep.subr.bf16.mxu1 %v2575_v56 }
  0x95   : > { %820 = vmatmul.mubr.bf16.gmra.mrb[4].mxu0 %v1934_v57  ;;  %v2580_v57 = vld [vmem:[#allocation6 + $0x138] sm:$0xff]  }
  0x96   : > { %917 = vmatmul.mubr.bf16.gmra.mrb[4].mxu1 %v1936_v58  ;;  %827 = vmatprep.mubr.bf16.mxu0 %v1940_v59  ;;  %v1949_v58 = vcombine.low %v3061_v24, %v3070_v27  ;;  %v1951_v59 = vcombine.low %v3064_v25, %v3073_v28 }
  0x97   : > { %924 = vmatprep.mubr.bf16.mxu1 %v1942_v60  ;;  %2352 = vmatpush3.bf16.msra.mxu0 %v2575_v56  ;;  %v1955_v60 = vcombine.high %v3079_v30, %v3088_v33 }
  0x98   : > { %2421 = vmatpush3.bf16.msra.mxu1 %v2575_v56  ;;  %2353 = vmatprep.subr.bf16.mxu0 %v2576_v61  ;;  %v1952_v56 = vcombine.high %v3064_v25, %v3073_v28 }
  0x99   : > { %2414 = vmatprep.subr.bf16.mxu1 %v2576_v61 }
  0x9b   : > { %2354 = vmatpush3.bf16.msra.mxu0 %v2576_v61 }
  0x9c   : > { %2422 = vmatpush3.bf16.msra.mxu1 %v2576_v61  ;;  %2355 = vmatprep.subr.bf16.mxu0 %v2577_v62  ;;  %v1957_v61 = vcombine.high %v3082_v31, %v3091_v34 }
  0x9d   : > { %828 = vmatmul.mubr.bf16.gmra.mrb[8].mxu0 %v1939_v63  ;;  %2415 = vmatprep.subr.bf16.mxu1 %v2577_v62  ;;  %v1956_v63 = vcombine.low %v3082_v31, %v3091_v34 }
  0x9e   : > { %925 = vmatmul.mubr.bf16.gmra.mrb[8].mxu1 %v1941_v48  ;;  %835 = vmatprep.mubr.bf16.mxu0 %v1945_v49  ;;  %v1960_v48 = vcombine.high %v3097_v36, %v3106_v39  ;;  %v1962_v49 = vcombine.high %v3100_v37, %v3109_v40 }
  0x9f   : > { %932 = vmatprep.mubr.bf16.mxu1 %v1947_v50  ;;  %2356 = vmatpush3.bf16.msra.mxu0 %v2577_v62  ;;  %v1959_v50 = vcombine.low %v3097_v36, %v3106_v39 }
  0xa0   : > { %2423 = vmatpush3.bf16.msra.mxu1 %v2577_v62  ;;  %2357 = vmatprep.subr.bf16.mxu0 %v2578_v51  ;;  %v1954_v62 = vcombine.low %v3079_v30, %v3088_v33 }
  0xa1   : > { %2416 = vmatprep.subr.bf16.mxu1 %v2578_v51 }
  0xa3   : > { %2358 = vmatpush3.bf16.msra.mxu0 %v2578_v51 }
  0xa4   : > { %2424 = vmatpush3.bf16.msra.mxu1 %v2578_v51  ;;  %2359 = vmatprep.subr.bf16.mxu0 %v2579_v52  ;;  %v1961_v51 = vcombine.low %v3100_v37, %v3109_v40 }
  0xa5   : > { %836 = vmatmul.mubr.bf16.gmra.mrb[12].mxu0 %v1944_v53  ;;  %2417 = vmatprep.subr.bf16.mxu1 %v2579_v52  ;;  %v1967_v53 = vcombine.high %v3118_v43, %v3127_v46 }
  0xa6   : > { %933 = vmatmul.mubr.bf16.gmra.mrb[12].mxu1 %v1946_v54  ;;  %843 = vmatprep.mubr.bf16.mxu0 %v1950_v55  ;;  %v1964_v54 = vcombine.low %v3115_v42, %v3124_v45  ;;  %v1966_v55 = vcombine.low %v3118_v43, %v3127_v46 }
  0xa7   : > { %940 = vmatprep.mubr.bf16.mxu1 %v1952_v56  ;;  %2360 = vmatpush3.bf16.msra.mxu0 %v2579_v52  ;;  %v1933_v56 = vcombine.low %v2995_v2, %v3004_v5 }
  0xa8   : > { %2425 = vmatpush3.bf16.msra.mxu1 %v2579_v52  ;;  %2361 = vmatprep.subr.bf16.mxu0 %v2580_v57  ;;  %v1965_v52 = vcombine.high %v3115_v42, %v3124_v45 }
  0xa9   : > { %2418 = vmatprep.subr.bf16.mxu1 %v2580_v57 }
  0xab   : > { %2362 = vmatpush3.bf16.msra.mxu0 %v2580_v57 }
  0xac   : > { %2426 = vmatpush3.bf16.msra.mxu1 %v2580_v57  ;;  %v1953_v57 = vcombine.low %v3067_v26, %v3076_v29 }
  0xad   : > { %844 = vmatmul.mubr.bf16.gmra.mrb[16].mxu0 %v1949_v58  ;;  %v1938_v58 = vcombine.low %v3013_v8, %v3022_v11 }
  0xae   : > { %941 = vmatmul.mubr.bf16.gmra.mrb[16].mxu1 %v1951_v59  ;;  %851 = vmatprep.mubr.bf16.mxu0 %v1955_v60  ;;  %v1958_v59 = vcombine.low %v3085_v32, %v3094_v35  ;;  %v1943_v60 = vcombine.low %v3031_v14, %v3040_v17 }
  0xaf   : > { %948 = vmatprep.mubr.bf16.mxu1 %v1957_v61  ;;  %v1963_v61 = vcombine.low %v3103_v38, %v3112_v41 }
  0xb5   : > { %852 = vmatmul.mubr.bf16.gmra.mrb[20].mxu0 %v1954_v62  ;;  %v1948_v62 = vcombine.low %v3049_v20, %v3058_v23 }
  0xb6   : > { %949 = vmatmul.mubr.bf16.gmra.mrb[20].mxu1 %v1956_v63  ;;  %859 = vmatprep.mubr.bf16.mxu0 %v1960_v48  ;;  %v1968_v63 = vcombine.low %v3121_v44, %v3130_v47 }
  0xb7   : > { %956 = vmatprep.mubr.bf16.mxu1 %v1962_v49 }
  0xbd   : > { %860 = vmatmul.mubr.bf16.gmra.mrb[24].mxu0 %v1959_v50 }
  0xbe   : > { %957 = vmatmul.mubr.bf16.gmra.mrb[24].mxu1 %v1961_v51  ;;  %867 = vmatprep.mubr.bf16.mxu0 %v1965_v52 }
  0xbf   : > { %964 = vmatprep.mubr.bf16.mxu1 %v1967_v53 }
  0xc5   : > { %868 = vmatmul.mubr.bf16.gmra.mrb[28].mxu0 %v1964_v54 }
  0xc6   : > { %965 = vmatmul.mubr.bf16.gmra.mrb[28].mxu1 %v1966_v55  ;;  %2363 = vmatprep.mubr.bf16.mxu0 %v1933_v56 }
  0xc7   : > { %2371 = vmatprep.mubr.bf16.mxu1 %v1953_v57 }
  0xcd   : > { %2364 = vmatmul.mubr.bf16.vlgmr.msra.gmra.mrb[32].mxu0 %v1938_v58 }
  0xce   : > { %2372 = vmatmul.mubr.bf16.vlgmr.msra.gmra.mrb[32].mxu1 %v1958_v59  ;;  %2367 = vmatprep.mubr.bf16.mxu0 %v1943_v60 }
  0xcf   : > { %2375 = vmatprep.mubr.bf16.mxu1 %v1963_v61 }
  0xd5   : > { %2368 = vmatmul.mubr.bf16.gmra.mrb[36].mxu0 %v1948_v62 }
  0xd6   : > { %2376 = vmatmul.mubr.bf16.gmra.mrb[36].mxu1 %v1968_v63 }
 0x160   : > { %v2075_v48 = vpop.f32.mrb[0].mxu0 }
 0x161   : > { %v2139_v49 = vpop.f32.mrb[0].mxu1  ;;  %v2076_v50 = vpop.f32.mrb[1].mxu0 }
 0x162   : > { %v2077_v51 = vadd.f32 %v2076_v50, %v2075_v48  ;;  %v2140_v52 = vpop.f32.mrb[1].mxu1  ;;  %v2078_v53 = vpop.f32.mrb[2].mxu0 }
 0x163   : > { %v2141_v54 = vadd.f32 %v2140_v52, %v2139_v49  ;;  %v2142_v55 = vpop.f32.mrb[2].mxu1  ;;  %v2079_v56 = vpop.f32.mrb[3].mxu0 }
 0x164   : > { %v2080_v57 = vadd.f32 %v2079_v56, %v2078_v53  ;;  %v2143_v58 = vpop.f32.mrb[3].mxu1 }
 0x165   : > { %v2144_v59 = vadd.f32 %v2143_v58, %v2142_v55  ;;  %v3216_v60 = vadd.f32 %v2141_v54, %v2077_v51 }
 0x167   : > { %v3218_v61 = vadd.f32 %v2144_v59, %v2080_v57 }
 0x168   : > { %v2081_v20 = vpop.f32.mrb[4].mxu0 }
 0x169   : > { %v2145_v44 = vpop.f32.mrb[4].mxu1  ;;  %v2082_v62 = vpop.f32.mrb[5].mxu0 }
 0x16a   : > { %v2083_v63 = vadd.f32 %v2082_v62, %v2081_v20  ;;  %v2146_v47 = vpop.f32.mrb[5].mxu1  ;;  %v2084_v23 = vpop.f32.mrb[6].mxu0 }
 0x16b   : > { %v2147_v38 = vadd.f32 %v2146_v47, %v2145_v44  ;;  %v2148_v48 = vpop.f32.mrb[6].mxu1  ;;  %v2085_v50 = vpop.f32.mrb[7].mxu0 }
 0x16c   : > { %v2086_v41 = vadd.f32 %v2085_v50, %v2084_v23  ;;  %v2149_v49 = vpop.f32.mrb[7].mxu1 }
 0x16d   : > { %v2150_v52 = vadd.f32 %v2149_v49, %v2148_v48  ;;  %v3220_v14 = vadd.f32 %v2147_v38, %v2083_v63 }
 0x16f   : > { %v3222_v53 = vadd.f32 %v2150_v52, %v2086_v41 }
 0x170   : > { %v2087_v51 = vpop.f32.mrb[8].mxu0 }
 0x171   : > { %v2151_v54 = vpop.f32.mrb[8].mxu1  ;;  %v2088_v55 = vpop.f32.mrb[9].mxu0 }
 0x172   : > { %v2089_v56 = vadd.f32 %v2088_v55, %v2087_v51  ;;  %v2152_v57 = vpop.f32.mrb[9].mxu1  ;;  %v2090_v58 = vpop.f32.mrb[10].mxu0 }
 0x173   : > { %v2153_v59 = vadd.f32 %v2152_v57, %v2151_v54  ;;  %v2154_v20 = vpop.f32.mrb[10].mxu1  ;;  %v2091_v62 = vpop.f32.mrb[11].mxu0 }
 0x174   : > { %v2092_v17 = vadd.f32 %v2091_v62, %v2090_v58  ;;  %v2155_v44 = vpop.f32.mrb[11].mxu1 }
 0x175   : > { %v2156_v47 = vadd.f32 %v2155_v44, %v2154_v20  ;;  %v3224_v32 = vadd.f32 %v2153_v59, %v2089_v56 }
 0x177   : > { %v3226_v23 = vadd.f32 %v2156_v47, %v2092_v17 }
 0x178   : > { %v2093_v38 = vpop.f32.mrb[12].mxu0 }
 0x179   : > { %v2157_v63 = vpop.f32.mrb[12].mxu1  ;;  %v2094_v41 = vpop.f32.mrb[13].mxu0 }
 0x17a   : > { %v2095_v48 = vadd.f32 %v2094_v41, %v2093_v38  ;;  %v2158_v50 = vpop.f32.mrb[13].mxu1  ;;  %v2096_v49 = vpop.f32.mrb[14].mxu0 }
 0x17b   : > { %v2159_v52 = vadd.f32 %v2158_v50, %v2157_v63  ;;  %v2160_v51 = vpop.f32.mrb[14].mxu1  ;;  %v2097_v55 = vpop.f32.mrb[15].mxu0 }
 0x17c   : > { %v2098_v35 = vadd.f32 %v2097_v55, %v2096_v49  ;;  %v2161_v54 = vpop.f32.mrb[15].mxu1 }
 0x17d   : > { %v2162_v57 = vadd.f32 %v2161_v54, %v2160_v51  ;;  %v3228_v8 = vadd.f32 %v2159_v52, %v2095_v48 }
 0x17f   : > { %v3230_v58 = vadd.f32 %v2162_v57, %v2098_v35 }
 0x180   : > { %v2099_v56 = vpop.f32.mrb[16].mxu0 }
 0x181   : > { %v2163_v59 = vpop.f32.mrb[16].mxu1  ;;  %v2100_v17 = vpop.f32.mrb[17].mxu0 }
 0x182   : > { %v2101_v20 = vadd.f32 %v2100_v17, %v2099_v56  ;;  %v2164_v62 = vpop.f32.mrb[17].mxu1  ;;  %v2102_v44 = vpop.f32.mrb[18].mxu0 }
 0x183   : > { %v2165_v47 = vadd.f32 %v2164_v62, %v2163_v59  ;;  %v2166_v38 = vpop.f32.mrb[18].mxu1  ;;  %v2103_v41 = vpop.f32.mrb[19].mxu0 }
 0x184   : > { %v2104_v11 = vadd.f32 %v2103_v41, %v2102_v44  ;;  %v2167_v63 = vpop.f32.mrb[19].mxu1 }
 0x185   : > { %v2168_v50 = vadd.f32 %v2167_v63, %v2166_v38  ;;  %v943_v26 = vadd.f32 %v2165_v47, %v2101_v20 }
 0x187   : > { %v946_v49 = vadd.f32 %v2168_v50, %v2104_v11 }
 0x188   : > { %v2105_v55 = vpop.f32.mrb[20].mxu0 }
 0x189   : > { %v2169_v51 = vpop.f32.mrb[20].mxu1  ;;  %v2106_v48 = vpop.f32.mrb[21].mxu0 }
 0x18a   : > { %v2107_v52 = vadd.f32 %v2106_v48, %v2105_v55  ;;  %v2170_v35 = vpop.f32.mrb[21].mxu1  ;;  %v2108_v54 = vpop.f32.mrb[22].mxu0 }
 0x18b   : > { %v2171_v57 = vadd.f32 %v2170_v35, %v2169_v51  ;;  %v2172_v29 = vpop.f32.mrb[22].mxu1  ;;  %v2109_v2 = vpop.f32.mrb[23].mxu0 }
 0x18c   : > { %v2110_v56 = vadd.f32 %v2109_v2, %v2108_v54  ;;  %v2173_v17 = vpop.f32.mrb[23].mxu1 }
 0x18d   : > { %v2174_v5 = vadd.f32 %v2173_v17, %v2172_v29  ;;  %v951_v59 = vadd.f32 %v2171_v57, %v2107_v52 }
 0x18f   : > { %v954_v62 = vadd.f32 %v2174_v5, %v2110_v56 }
 0x190   : > { %v2111_v43 = vpop.f32.mrb[24].mxu0 }
 0x191   : > { %v2175_v44 = vpop.f32.mrb[24].mxu1  ;;  %v2112_v41 = vpop.f32.mrb[25].mxu0 }
 0x192   : > { %v2113_v38 = vadd.f32 %v2112_v41, %v2111_v43  ;;  %v2176_v20 = vpop.f32.mrb[25].mxu1  ;;  %v2114_v11 = vpop.f32.mrb[26].mxu0 }
 0x193   : > { %v2177_v47 = vadd.f32 %v2176_v20, %v2175_v44  ;;  %v2178_v63 = vpop.f32.mrb[26].mxu1  ;;  %v2115_v50 = vpop.f32.mrb[27].mxu0 }
 0x194   : > { %v2116_v55 = vadd.f32 %v2115_v50, %v2114_v11  ;;  %v2179_v48 = vpop.f32.mrb[27].mxu1 }
 0x195   : > { %v2180_v46 = vadd.f32 %v2179_v48, %v2178_v63  ;;  %v959_v51 = vadd.f32 %v2177_v47, %v2113_v38 }
 0x197   : > { %v962_v35 = vadd.f32 %v2180_v46, %v2116_v55 }
 0x198   : > { %v2117_v2 = vpop.f32.mrb[28].mxu0 }
 0x199   : > { %v2181_v54 = vpop.f32.mrb[28].mxu1  ;;  %v2118_v29 = vpop.f32.mrb[29].mxu0 }
 0x19a   : > { %v2119_v52 = vadd.f32 %v2118_v29, %v2117_v2  ;;  %v2182_v5 = vpop.f32.mrb[29].mxu1  ;;  %v2120_v57 = vpop.f32.mrb[30].mxu0 }
 0x19b   : > { %v2183_v56 = vadd.f32 %v2182_v5, %v2181_v54  ;;  %v2184_v17 = vpop.f32.mrb[30].mxu1  ;;  %v2121_v43 = vpop.f32.mrb[31].mxu0 }
 0x19c   : > { %v2122_v41 = vadd.f32 %v2121_v43, %v2120_v57  ;;  %v2185_v42 = vpop.f32.mrb[31].mxu1 }
 0x19d   : > { %v2186_v44 = vadd.f32 %v2185_v42, %v2184_v17  ;;  %v967_v20 = vadd.f32 %v2183_v56, %v2119_v52 }
 0x19f   : > { %v970_v11 = vadd.f32 %v2186_v44, %v2122_v41 }
 0x1a0   : > { %v2365_v63 = vpop.f32.mrb[32].mxu0 }
 0x1a1   : > { %v1016_v38 = vadd.f32 %v2365_v63, %v3220_v14  ;;  %v2373_v46 = vpop.f32.mrb[32].mxu1  ;;  %v1007_v47 = vpop.f32.mrb[33].mxu0 }
 0x1a2   : > { %v1048_v50 = vadd.f32 %v2373_v46, %v951_v59  ;;  %v1008_v55 = vadd.f32 %v1007_v47, %v3216_v60  ;;  %v1039_v48 = vpop.f32.mrb[33].mxu1  ;;  %v2366_v2 = vpop.f32.mrb[34].mxu0 }
 0x1a3   : > { %v1040_v54 = vadd.f32 %v1039_v48, %v943_v26  ;;  %v1019_v29 = vadd.f32 %v2366_v2, %v3222_v53  ;;  %v2374_v5 = vpop.f32.mrb[34].mxu1  ;;  %v1010_v42 = vpop.f32.mrb[35].mxu0 }
 0x1a4   : > { %v1051_v52 = vadd.f32 %v2374_v5, %v954_v62  ;;  %v1011_v57 = vadd.f32 %v1010_v42, %v3218_v61  ;;  %v1042_v56 = vpop.f32.mrb[35].mxu1 }
 0x1a5   : > { %v1071_v17 = vpack.c.bf16 %v1019_v29, %v1016_v38  ;;  %v1043_v43 = vadd.f32 %v1042_v56, %v946_v49 }
 0x1a6   : > { %v1075_v14 = vpack.c.bf16 %v1051_v52, %v1048_v50  ;;  %v1070_v41 = vpack.c.bf16 %v1011_v57, %v1008_v55 }
 0x1a7   : > { %1083 = vst [vmem:[%s1081_s25 + $0x8] sm:$0xff] %v1071_v17  ;;  %v1074_v59 = vpack.c.bf16 %v1043_v43, %v1040_v54 }
 0x1a8   : > { %1087 = vst [vmem:[%s1081_s25 + $0x28] sm:$0xff] %v1075_v14  ;;  %1082 = vst [vmem:[%s1081_s25] sm:$0xff] %v1070_v41  ;;  %v2369_v60 = vpop.f32.mrb[36].mxu0 }
 0x1a9   : > { %1086 = vst [vmem:[%s1081_s25 + $0x20] sm:$0xff] %v1074_v59  ;;  %v1032_v26 = vadd.f32 %v2369_v60, %v3228_v8  ;;  %v2377_v53 = vpop.f32.mrb[36].mxu1  ;;  %v1023_v44 = vpop.f32.mrb[37].mxu0 }
 0x1aa   : > { %v1064_v63 = vadd.f32 %v2377_v53, %v967_v20  ;;  %v1024_v62 = vadd.f32 %v1023_v44, %v3224_v32  ;;  %v1055_v61 = vpop.f32.mrb[37].mxu1  ;;  %v2370_v46 = vpop.f32.mrb[38].mxu0 }
 0x1ab   : > { %v1056_v38 = vadd.f32 %v1055_v61, %v959_v51  ;;  %v1035_v49 = vadd.f32 %v2370_v46, %v3230_v58  ;;  %v2378_v47 = vpop.f32.mrb[38].mxu1  ;;  %v1026_v50 = vpop.f32.mrb[39].mxu0 }
 0x1ac   : > { %v1067_v55 = vadd.f32 %v2378_v47, %v970_v11  ;;  %v1027_v48 = vadd.f32 %v1026_v50, %v3226_v23  ;;  %v1058_v2 = vpop.f32.mrb[39].mxu1 }
 0x1ad   : > { %v1073_v54 = vpack.c.bf16 %v1035_v49, %v1032_v26  ;;  %v1059_v29 = vadd.f32 %v1058_v2, %v962_v35 }
 0x1ae   : > { %v1077_v5 = vpack.c.bf16 %v1067_v55, %v1064_v63  ;;  %v1072_v8 = vpack.c.bf16 %v1027_v48, %v1024_v62 }
 0x1af   : > { %1085 = vst [vmem:[%s1081_s25 + $0x18] sm:$0xff] %v1073_v54  ;;  %v1076_v42 = vpack.c.bf16 %v1059_v29, %v1056_v38 }
 0x1b0   : > { %1089 = vst [vmem:[%s1081_s25 + $0x38] sm:$0xff] %v1077_v5  ;;  %1084 = vst [vmem:[%s1081_s25 + $0x10] sm:$0xff] %v1072_v8 }
 0x1b1   : > { %1088 = vst [vmem:[%s1081_s25 + $0x30] sm:$0xff] %v1076_v42 }
 0x1b2 PF: > { %p2010_p3 = scmp.ne.s32.totalorder %s2791_s16, 1 }
 0x1b3   : > { %v2013_v23 = vcombine.high (!%p2010_p3), %v2989_v0, %v2998_v3  ;;  %v2015_v35 = vcombine.high (!%p2010_p3), %v2992_v1, %v3001_v4 }
 0x1b4   : > { %1093 = sbr.rel (%p2010_p3) target bundleno = 1100 (0x44c), region = 48 }
 0x1b5   : > { %1381 = vmatprep.mubr.bf16.mxu0 (!%p2010_p3), %v2013_v23  ;;  %1478 = vmatprep.mubr.bf16.mxu1 (!%p2010_p3), %v2015_v35  ;;  %v2020_v23 = vcombine.high (!%p2010_p3), %v3010_v7, %v3019_v10 }
 0x1b8   : > { %v1102_v32 = vld [vmem:[#allocation2 + $0x40] sm:$0xff] (!%p2010_p3)  ;;  %v1103_v11 = vld [vmem:[#allocation2 + $0x48] sm:$0xff] (!%p2010_p3)  ;;  %v1104_v17 = vld [vmem:[#allocation2 + $0x50] sm:$0xff] (!%p2010_p3) }
 0x1b9   : > { %v1118_v58 = vld [vmem:[#allocation2 + $0xc0] sm:$0xff] (!%p2010_p3)  ;;  %2203 = vmatprep.subr.bf16.mxu0 (!%p2010_p3), %v1102_v32  ;;  %v1119_v52 = vld [vmem:[#allocation2 + $0xc8] sm:$0xff] (!%p2010_p3)  ;;  %v1120_v43 = vld [vmem:[#allocation2 + $0xd0] sm:$0xff] (!%p2010_p3)  ;;  %v2012_v32 = vcombine.low (!%p2010_p3), %v2989_v0, %v2998_v3  ;;  %v2019_v3 = vcombine.low (!%p2010_p3), %v3010_v7, %v3019_v10  ;;  %v2024_v7 = vcombine.low (!%p2010_p3), %v3028_v13, %v3037_v16  ;;  %v2028_v10 = vcombine.high (!%p2010_p3), %v3043_v18, %v3052_v21 }
 0x1ba   : > { %v1094_v51 = vld [vmem:[#allocation2] sm:$0xff] (!%p2010_p3)  ;;  %2267 = vmatprep.subr.bf16.mxu1 (!%p2010_p3), %v1118_v58  ;;  %v1095_v57 = vld [vmem:[#allocation2 + $0x8] sm:$0xff] (!%p2010_p3)  ;;  %v1096_v14 = vld [vmem:[#allocation2 + $0x10] sm:$0xff] (!%p2010_p3)  ;;  %v2014_v58 = vcombine.low (!%p2010_p3), %v2992_v1, %v3001_v4  ;;  %v2017_v1 = vcombine.low (!%p2010_p3), %v3007_v6, %v3016_v9  ;;  %v2023_v4 = vcombine.high (!%p2010_p3), %v3025_v12, %v3034_v15 }
 0x1bb   : > { %v1110_v20 = vld [vmem:[#allocation2 + $0x80] sm:$0xff]  ;;  %2204 = vmatpush3.bf16.msra.mxu0 %v1094_v51  ;;  %v1111_v56 = vld [vmem:[#allocation2 + $0x88] sm:$0xff]  ;;  %v1112_v41 = vld [vmem:[#allocation2 + $0x90] sm:$0xff]  ;;  %v2018_v51 = vcombine.high %v3007_v6, %v3016_v9  ;;  %v2022_v6 = vcombine.low %v3025_v12, %v3034_v15  ;;  %v2027_v12 = vcombine.low %v3043_v18, %v3052_v21  ;;  %v2032_v18 = vcombine.low %v3061_v24, %v3070_v27 }
 0x1bc   : > { %2268 = vmatpush3.bf16.msra.mxu1 %v1110_v20  ;;  %2205 = vmatprep.subr.bf16.mxu0 %v1103_v11  ;;  %v1105_v59 = vld [vmem:[#allocation2 + $0x58] sm:$0xff]  ;;  %v1106_v44 = vld [vmem:[#allocation2 + $0x60] sm:$0xff]  ;;  %v1107_v46 = vld [vmem:[#allocation2 + $0x68] sm:$0xff]  ;;  %v2025_v20 = vcombine.high %v3028_v13, %v3037_v16  ;;  %v2029_v13 = vcombine.low %v3046_v19, %v3055_v22  ;;  %v2033_v16 = vcombine.high %v3061_v24, %v3070_v27 }
 0x1bd   : > { %2269 = vmatprep.subr.bf16.mxu1 %v1119_v52  ;;  %v1121_v60 = vld [vmem:[#allocation2 + $0xd8] sm:$0xff]  ;;  %v1122_v63 = vld [vmem:[#allocation2 + $0xe0] sm:$0xff]  ;;  %v1123_v38 = vld [vmem:[#allocation2 + $0xe8] sm:$0xff]  ;;  %v2030_v52 = vcombine.high %v3046_v19, %v3055_v22  ;;  %v2034_v19 = vcombine.low %v3064_v25, %v3073_v28  ;;  %v2038_v21 = vcombine.high %v3079_v30, %v3088_v33  ;;  %v2040_v22 = vcombine.high %v3082_v31, %v3091_v34 }
 0x1be   : > { %v1097_v26 = vld [vmem:[#allocation2 + $0x18] sm:$0xff]  ;;  %v1098_v62 = vld [vmem:[#allocation2 + $0x20] sm:$0xff]  ;;  %v1099_v49 = vld [vmem:[#allocation2 + $0x28] sm:$0xff]  ;;  %v2039_v24 = vcombine.low %v3082_v31, %v3091_v34  ;;  %v2045_v27 = vcombine.high %v3100_v37, %v3109_v40 }
 0x1bf   : > { %2206 = vmatpush3.bf16.msra.mxu0 %v1095_v57  ;;  %v1113_v53 = vld [vmem:[#allocation2 + $0x98] sm:$0xff]  ;;  %v1114_v61 = vld [vmem:[#allocation2 + $0xa0] sm:$0xff]  ;;  %v1115_v47 = vld [vmem:[#allocation2 + $0xa8] sm:$0xff] }
 0x1c0   : > { %2270 = vmatpush3.bf16.msra.mxu1 %v1111_v56  ;;  %2207 = vmatprep.subr.bf16.mxu0 %v1104_v17  ;;  %v1108_v50 = vld [vmem:[#allocation2 + $0x70] sm:$0xff]  ;;  %v1109_v54 = vld [vmem:[#allocation2 + $0x78] sm:$0xff]  ;;  %v1126_v42 = vld [vmem:[#allocation2 + $0x100] sm:$0xff]  ;;  %v2035_v56 = vcombine.high %v3064_v25, %v3073_v28  ;;  %v2043_v25 = vcombine.high %v3097_v36, %v3106_v39  ;;  %v2042_v28 = vcombine.low %v3097_v36, %v3106_v39 }
 0x1c1   : > { %2271 = vmatprep.subr.bf16.mxu1 %v1120_v43  ;;  %v1124_v55 = vld [vmem:[#allocation2 + $0xf0] sm:$0xff]  ;;  %v1125_v29 = vld [vmem:[#allocation2 + $0xf8] sm:$0xff]  ;;  %v1127_v35 = vld [vmem:[#allocation2 + $0x108] sm:$0xff]  ;;  %v2037_v43 = vcombine.low %v3079_v30, %v3088_v33 }
 0x1c2   : > { %v1100_v48 = vld [vmem:[#allocation2 + $0x30] sm:$0xff]  ;;  %v1101_v5 = vld [vmem:[#allocation2 + $0x38] sm:$0xff]  ;;  %v1130_v9 = vld [vmem:[#allocation2 + $0x120] sm:$0xff] }
 0x1c3   : > { %2208 = vmatpush3.bf16.msra.mxu0 %v1096_v14  ;;  %v1116_v2 = vld [vmem:[#allocation2 + $0xb0] sm:$0xff]  ;;  %v1117_v8 = vld [vmem:[#allocation2 + $0xb8] sm:$0xff]  ;;  %v1131_v57 = vld [vmem:[#allocation2 + $0x128] sm:$0xff]  ;;  %v2044_v14 = vcombine.low %v3100_v37, %v3109_v40 }
 0x1c4   : > { %2272 = vmatpush3.bf16.msra.mxu1 %v1112_v41  ;;  %2209 = vmatprep.subr.bf16.mxu0 %v1105_v59  ;;  %v1128_v0 = vld [vmem:[#allocation2 + $0x110] sm:$0xff]  ;;  %v1129_v11 = vld [vmem:[#allocation2 + $0x118] sm:$0xff]  ;;  %v3594_v31 = vld [vmem:[#allocation31_spill] sm:$0xff] }
 0x1c5   : > { %2273 = vmatprep.subr.bf16.mxu1 %v1121_v60  ;;  %v1132_v15 = vld [vmem:[#allocation2 + $0x130] sm:$0xff]  ;;  %v1133_v17 = vld [vmem:[#allocation2 + $0x138] sm:$0xff]  ;;  %v3596_v36 = vld [vmem:[#allocation15_spill] sm:$0xff] }
 0x1c6   : > { %v3593_v30 = vld [vmem:[#allocation28_spill] sm:$0xff]  ;;  %v3595_v34 = vld [vmem:[#allocation29_spill] sm:$0xff]  ;;  %v3597_v39 = vld [vmem:[#allocation14_spill] sm:$0xff] }
 0x1c7   : > { %2210 = vmatpush3.bf16.msra.mxu0 %v1097_v26  ;;  %v2048_v33 = vcombine.high %v3593_v30, %v3124_v45  ;;  %v2050_v41 = vcombine.high %v3595_v34, %v3594_v31  ;;  %v2047_v59 = vcombine.low %v3593_v30, %v3124_v45  ;;  %v2049_v60 = vcombine.low %v3595_v34, %v3594_v31  ;;  %v3598_v37 = vld [vmem:[#allocation23_spill] sm:$0xff]  ;;  %v3599_v40 = vld [vmem:[#allocation22_spill] sm:$0xff] }
 0x1c8   : > { %2274 = vmatpush3.bf16.msra.mxu1 %v1113_v53  ;;  %2211 = vmatprep.subr.bf16.mxu0 %v1106_v44  ;;  %v2016_v26 = vcombine.low %v3597_v39, %v3596_v36  ;;  %v2036_v53 = vcombine.low %v3599_v40, %v3598_v37  ;;  %v3600_v44 = vld [vmem:[#allocation17_spill] sm:$0xff]  ;;  %v3604_v45 = vld [vmem:[#allocation19_spill] sm:$0xff] }
 0x1c9   : > { %2275 = vmatprep.subr.bf16.mxu1 %v1122_v63  ;;  %v3601_v63 = vld [vmem:[#allocation16_spill] sm:$0xff] }
 0x1cb   : > { %2212 = vmatpush3.bf16.msra.mxu0 %v1098_v62  ;;  %v2021_v62 = vcombine.low %v3601_v63, %v3600_v44 }
 0x1cc   : > { %2276 = vmatpush3.bf16.msra.mxu1 %v1114_v61  ;;  %2213 = vmatprep.subr.bf16.mxu0 %v1107_v46  ;;  %v3602_v61 = vld [vmem:[#allocation25_spill] sm:$0xff]  ;;  %v3603_v46 = vld [vmem:[#allocation24_spill] sm:$0xff] }
 0x1cd   : > { %2277 = vmatprep.subr.bf16.mxu1 %v1123_v38  ;;  %v2041_v38 = vcombine.low %v3603_v46, %v3602_v61 }
 0x1cf   : > { %2214 = vmatpush3.bf16.msra.mxu0 %v1099_v49  ;;  %v3605_v49 = vld [vmem:[#allocation18_spill] sm:$0xff] }
 0x1d0   : > { %2278 = vmatpush3.bf16.msra.mxu1 %v1115_v47  ;;  %2215 = vmatprep.subr.bf16.mxu0 %v1108_v50  ;;  %v2026_v47 = vcombine.low %v3605_v49, %v3604_v45  ;;  %v3606_v50 = vld [vmem:[#allocation27_spill] sm:$0xff] }
 0x1d1   : > { %2279 = vmatprep.subr.bf16.mxu1 %v1124_v55  ;;  %v3607_v55 = vld [vmem:[#allocation26_spill] sm:$0xff] }
 0x1d3   : > { %2216 = vmatpush3.bf16.msra.mxu0 %v1100_v48  ;;  %v2046_v48 = vcombine.low %v3607_v55, %v3606_v50 }
 0x1d4   : > { %2280 = vmatpush3.bf16.msra.mxu1 %v1116_v2  ;;  %2217 = vmatprep.subr.bf16.mxu0 %v1109_v54  ;;  %v3608_v2 = vld [vmem:[#allocation21_spill] sm:$0xff]  ;;  %v3609_v54 = vld [vmem:[#allocation20_spill] sm:$0xff] }
 0x1d5   : > { %2281 = vmatprep.subr.bf16.mxu1 %v1125_v29  ;;  %v2031_v29 = vcombine.low %v3609_v54, %v3608_v2 }
 0x1d7   : > { %2218 = vmatpush3.bf16.msra.mxu0 %v1101_v5  ;;  %v3610_v5 = vld [vmem:[#allocation32_spill] sm:$0xff] }
 0x1d8   : > { %2282 = vmatpush3.bf16.msra.mxu1 %v1117_v8  ;;  %2379 = vmatprep.subr.bf16.mxu0 %v1126_v42  ;;  %v3611_v8 = vld [vmem:[#allocation30_spill] sm:$0xff] }
 0x1d9   : > { %2427 = vmatprep.subr.bf16.mxu1 %v1126_v42 }
 0x1da   : > { %1382 = vmatmul.mubr.bf16.vlgmr.msra.gmra.mrb[0].mxu0 %v2012_v32 }
 0x1db   : > { %1479 = vmatmul.mubr.bf16.vlgmr.msra.gmra.mrb[0].mxu1 %v2014_v58  ;;  %2380 = vmatpush3.bf16.msra.mxu0 %v1126_v42 }
 0x1dc   : > { %2435 = vmatpush3.bf16.msra.mxu1 %v1126_v42  ;;  %1389 = vmatprep.mubr.bf16.mxu0 %v2018_v51  ;;  %v2051_v42 = vcombine.low %v3611_v8, %v3610_v5  ;;  %v3326_v51 = vld [vmem:[%s3536_s2] ss:$0 sm:$0xff] }
 0x1dd   : > { %1486 = vmatprep.mubr.bf16.mxu1 %v2020_v23  ;;  %2381 = vmatprep.subr.bf16.mxu0 %v1127_v35 }
 0x1de   : > { %2428 = vmatprep.subr.bf16.mxu1 %v1127_v35 }
 0x1df   : > { %2382 = vmatpush3.bf16.msra.mxu0 %v1127_v35 }
 0x1e0   : > { %2436 = vmatpush3.bf16.msra.mxu1 %v1127_v35  ;;  %2383 = vmatprep.subr.bf16.mxu0 %v1128_v0 }
 0x1e1   : > { %2429 = vmatprep.subr.bf16.mxu1 %v1128_v0 }
 0x1e2   : > { %1390 = vmatmul.mubr.bf16.gmra.mrb[4].mxu0 %v2017_v1 }
 0x1e3   : > { %1487 = vmatmul.mubr.bf16.gmra.mrb[4].mxu1 %v2019_v3  ;;  %1397 = vmatprep.mubr.bf16.mxu0 %v2023_v4 }
 0x1e4   : > { %1494 = vmatprep.mubr.bf16.mxu1 %v2025_v20  ;;  %2384 = vmatpush3.bf16.msra.mxu0 %v1128_v0 }
 0x1e5   : > { %2437 = vmatpush3.bf16.msra.mxu1 %v1128_v0  ;;  %2385 = vmatprep.subr.bf16.mxu0 %v1129_v11 }
 0x1e6   : > { %2430 = vmatprep.subr.bf16.mxu1 %v1129_v11 }
 0x1e8   : > { %2386 = vmatpush3.bf16.msra.mxu0 %v1129_v11 }
 0x1e9   : > { %2438 = vmatpush3.bf16.msra.mxu1 %v1129_v11  ;;  %2387 = vmatprep.subr.bf16.mxu0 %v1130_v9 }
 0x1ea   : > { %2431 = vmatprep.subr.bf16.mxu1 %v1130_v9  ;;  %1398 = vmatmul.mubr.bf16.gmra.mrb[8].mxu0 %v2022_v6 }
 0x1eb   : > { %1495 = vmatmul.mubr.bf16.gmra.mrb[8].mxu1 %v2024_v7  ;;  %1405 = vmatprep.mubr.bf16.mxu0 %v2028_v10 }
 0x1ec   : > { %1502 = vmatprep.mubr.bf16.mxu1 %v2030_v52  ;;  %2388 = vmatpush3.bf16.msra.mxu0 %v1130_v9 }
 0x1ed   : > { %2439 = vmatpush3.bf16.msra.mxu1 %v1130_v9  ;;  %2389 = vmatprep.subr.bf16.mxu0 %v1131_v57 }
 0x1ee   : > { %2432 = vmatprep.subr.bf16.mxu1 %v1131_v57 }
 0x1f0   : > { %2390 = vmatpush3.bf16.msra.mxu0 %v1131_v57 }
 0x1f1   : > { %2440 = vmatpush3.bf16.msra.mxu1 %v1131_v57  ;;  %2391 = vmatprep.subr.bf16.mxu0 %v1132_v15 }
 0x1f2   : > { %2433 = vmatprep.subr.bf16.mxu1 %v1132_v15  ;;  %1406 = vmatmul.mubr.bf16.gmra.mrb[12].mxu0 %v2027_v12 }
 0x1f3   : > { %1503 = vmatmul.mubr.bf16.gmra.mrb[12].mxu1 %v2029_v13  ;;  %1413 = vmatprep.mubr.bf16.mxu0 %v2033_v16 }
 0x1f4   : > { %1510 = vmatprep.mubr.bf16.mxu1 %v2035_v56  ;;  %2392 = vmatpush3.bf16.msra.mxu0 %v1132_v15 }
 0x1f5   : > { %2441 = vmatpush3.bf16.msra.mxu1 %v1132_v15  ;;  %2393 = vmatprep.subr.bf16.mxu0 %v1133_v17 }
 0x1f6   : > { %2434 = vmatprep.subr.bf16.mxu1 %v1133_v17 }
 0x1f8   : > { %2394 = vmatpush3.bf16.msra.mxu0 %v1133_v17 }
 0x1f9   : > { %2442 = vmatpush3.bf16.msra.mxu1 %v1133_v17 }
 0x1fa   : > { %1414 = vmatmul.mubr.bf16.gmra.mrb[16].mxu0 %v2032_v18 }
 0x1fb   : > { %1511 = vmatmul.mubr.bf16.gmra.mrb[16].mxu1 %v2034_v19  ;;  %1421 = vmatprep.mubr.bf16.mxu0 %v2038_v21 }
 0x1fc   : > { %1518 = vmatprep.mubr.bf16.mxu1 %v2040_v22 }
 0x202   : > { %1422 = vmatmul.mubr.bf16.gmra.mrb[20].mxu0 %v2037_v43 }
 0x203   : > { %1519 = vmatmul.mubr.bf16.gmra.mrb[20].mxu1 %v2039_v24  ;;  %1429 = vmatprep.mubr.bf16.mxu0 %v2043_v25 }
 0x204   : > { %1526 = vmatprep.mubr.bf16.mxu1 %v2045_v27 }
 0x20a   : > { %1430 = vmatmul.mubr.bf16.gmra.mrb[24].mxu0 %v2042_v28 }
 0x20b   : > { %1527 = vmatmul.mubr.bf16.gmra.mrb[24].mxu1 %v2044_v14  ;;  %1437 = vmatprep.mubr.bf16.mxu0 %v2048_v33 }
 0x20c   : > { %1534 = vmatprep.mubr.bf16.mxu1 %v2050_v41 }
 0x212   : > { %1438 = vmatmul.mubr.bf16.gmra.mrb[28].mxu0 %v2047_v59 }
 0x213   : > { %1535 = vmatmul.mubr.bf16.gmra.mrb[28].mxu1 %v2049_v60  ;;  %2395 = vmatprep.mubr.bf16.mxu0 %v2016_v26 }
 0x214   : > { %2403 = vmatprep.mubr.bf16.mxu1 %v2036_v53 }
 0x21a   : > { %2396 = vmatmul.mubr.bf16.vlgmr.msra.gmra.mrb[32].mxu0 %v2021_v62 }
 0x21b   : > { %2404 = vmatmul.mubr.bf16.vlgmr.msra.gmra.mrb[32].mxu1 %v2041_v38  ;;  %2399 = vmatprep.mubr.bf16.mxu0 %v2026_v47 }
 0x21c   : > { %2407 = vmatprep.mubr.bf16.mxu1 %v2046_v48 }
 0x222   : > { %2400 = vmatmul.mubr.bf16.gmra.mrb[36].mxu0 %v2031_v29 }
 0x223   : > { %2408 = vmatmul.mubr.bf16.gmra.mrb[36].mxu1 %v2051_v42 }
 0x2ad   : > { %v2219_v32 = vpop.f32.mrb[0].mxu0 }
 0x2ae   : > { %v2283_v58 = vpop.f32.mrb[0].mxu1  ;;  %v2220_v23 = vpop.f32.mrb[1].mxu0 }
 0x2af   : > { %v2284_v35 = vpop.f32.mrb[1].mxu1  ;;  %v2221_v0 = vadd.f32 %v2220_v23, %v2219_v32  ;;  %v2222_v3 = vpop.f32.mrb[2].mxu0 }
 0x2b0   : > { %v2285_v1 = vadd.f32 %v2284_v35, %v2283_v58  ;;  %v2286_v4 = vpop.f32.mrb[2].mxu1  ;;  %v2223_v20 = vpop.f32.mrb[3].mxu0 }
 0x2b1   : > { %v2287_v11 = vpop.f32.mrb[3].mxu1  ;;  %v1384_v6 = vadd.f32 %v2221_v0, %v3326_v51  ;;  %v2224_v7 = vadd.f32 %v2223_v20, %v2222_v3 }
 0x2b2   : > { %v2288_v9 = vadd.f32 %v2287_v11, %v2286_v4 }
 0x2b3   : > { %v1387_v10 = vadd.f32 %v2224_v7, %v3326_v51  ;;  %v3330_v52 = vadd.f32 %v2285_v1, %v1384_v6 }
 0x2b5   : > { %v2225_v57 = vpop.f32.mrb[4].mxu0  ;;  %v3332_v13 = vadd.f32 %v2288_v9, %v1387_v10 }
 0x2b6   : > { %v2289_v12 = vpop.f32.mrb[4].mxu1  ;;  %v2226_v15 = vpop.f32.mrb[5].mxu0 }
 0x2b7   : > { %v2290_v16 = vpop.f32.mrb[5].mxu1  ;;  %v2227_v56 = vadd.f32 %v2226_v15, %v2225_v57  ;;  %v2228_v18 = vpop.f32.mrb[6].mxu0 }
 0x2b8   : > { %v2291_v17 = vadd.f32 %v2290_v16, %v2289_v12  ;;  %v2292_v19 = vpop.f32.mrb[6].mxu1  ;;  %v2229_v21 = vpop.f32.mrb[7].mxu0 }
 0x2b9   : > { %v2293_v22 = vpop.f32.mrb[7].mxu1  ;;  %v1392_v43 = vadd.f32 %v2227_v56, %v3326_v51  ;;  %v2230_v24 = vadd.f32 %v2229_v21, %v2228_v18 }
 0x2ba   : > { %v2294_v25 = vadd.f32 %v2293_v22, %v2292_v19 }
 0x2bb   : > { %v1395_v27 = vadd.f32 %v2230_v24, %v3326_v51  ;;  %v3336_v28 = vadd.f32 %v2291_v17, %v1392_v43 }
 0x2bd   : > { %v2231_v14 = vpop.f32.mrb[8].mxu0  ;;  %v3338_v33 = vadd.f32 %v2294_v25, %v1395_v27 }
 0x2be   : > { %v2295_v30 = vpop.f32.mrb[8].mxu1  ;;  %v2232_v31 = vpop.f32.mrb[9].mxu0 }
 0x2bf   : > { %v2296_v34 = vpop.f32.mrb[9].mxu1  ;;  %v2233_v41 = vadd.f32 %v2232_v31, %v2231_v14  ;;  %v2234_v60 = vpop.f32.mrb[10].mxu0 }
 0x2c0   : > { %v2297_v59 = vadd.f32 %v2296_v34, %v2295_v30  ;;  %v2298_v36 = vpop.f32.mrb[10].mxu1  ;;  %v2235_v39 = vpop.f32.mrb[11].mxu0 }
 0x2c1   : > { %v2299_v26 = vpop.f32.mrb[11].mxu1  ;;  %v1400_v37 = vadd.f32 %v2233_v41, %v3326_v51  ;;  %v2236_v40 = vadd.f32 %v2235_v39, %v2234_v60 }
 0x2c2   : > { %v2300_v53 = vadd.f32 %v2299_v26, %v2298_v36 }
 0x2c3   : > { %v1403_v44 = vadd.f32 %v2236_v40, %v3326_v51  ;;  %v3342_v63 = vadd.f32 %v2297_v59, %v1400_v37 }
 0x2c5   : > { %v2237_v62 = vpop.f32.mrb[12].mxu0  ;;  %v3344_v46 = vadd.f32 %v2300_v53, %v1403_v44 }
 0x2c6   : > { %v2301_v61 = vpop.f32.mrb[12].mxu1  ;;  %v2238_v38 = vpop.f32.mrb[13].mxu0 }
 0x2c7   : > { %v2302_v45 = vpop.f32.mrb[13].mxu1  ;;  %v2239_v49 = vadd.f32 %v2238_v38, %v2237_v62  ;;  %v2240_v50 = vpop.f32.mrb[14].mxu0 }
 0x2c8   : > { %v2303_v47 = vadd.f32 %v2302_v45, %v2301_v61  ;;  %v2304_v55 = vpop.f32.mrb[14].mxu1  ;;  %v2241_v48 = vpop.f32.mrb[15].mxu0 }
 0x2c9   : > { %v2305_v2 = vpop.f32.mrb[15].mxu1  ;;  %v1408_v54 = vadd.f32 %v2239_v49, %v3326_v51  ;;  %v2242_v29 = vadd.f32 %v2241_v48, %v2240_v50 }
 0x2ca   : > { %v2306_v5 = vadd.f32 %v2305_v2, %v2304_v55 }
 0x2cb   : > { %v1411_v8 = vadd.f32 %v2242_v29, %v3326_v51  ;;  %v3348_v42 = vadd.f32 %v2303_v47, %v1408_v54 }
 0x2cd   : > { %v2243_v32 = vpop.f32.mrb[16].mxu0  ;;  %v3350_v23 = vadd.f32 %v2306_v5, %v1411_v8 }
 0x2ce   : > { %v2307_v58 = vpop.f32.mrb[16].mxu1  ;;  %v2244_v35 = vpop.f32.mrb[17].mxu0 }
 0x2cf   : > { %v2308_v0 = vpop.f32.mrb[17].mxu1  ;;  %v2245_v1 = vadd.f32 %v2244_v35, %v2243_v32  ;;  %v2246_v4 = vpop.f32.mrb[18].mxu0 }
 0x2d0   : > { %v2309_v3 = vadd.f32 %v2308_v0, %v2307_v58  ;;  %v2310_v20 = vpop.f32.mrb[18].mxu1  ;;  %v2247_v11 = vpop.f32.mrb[19].mxu0 }
 0x2d1   : > { %v2311_v6 = vpop.f32.mrb[19].mxu1  ;;  %v1416_v7 = vadd.f32 %v2245_v1, %v3326_v51  ;;  %v2248_v9 = vadd.f32 %v2247_v11, %v2246_v4 }
 0x2d2   : > { %v2312_v10 = vadd.f32 %v2311_v6, %v2310_v20 }
 0x2d3   : > { %v1419_v57 = vadd.f32 %v2248_v9, %v3326_v51  ;;  %v1513_v12 = vadd.f32 %v2309_v3, %v1416_v7 }
 0x2d5   : > { %v2249_v15 = vpop.f32.mrb[20].mxu0  ;;  %v3354_v56 = vadd.f32 %v2312_v10, %v1419_v57 }
 0x2d6   : > { %v2313_v16 = vpop.f32.mrb[20].mxu1  ;;  %v2250_v17 = vpop.f32.mrb[21].mxu0 }
 0x2d7   : > { %v2314_v18 = vpop.f32.mrb[21].mxu1  ;;  %v2251_v19 = vadd.f32 %v2250_v17, %v2249_v15  ;;  %v2252_v22 = vpop.f32.mrb[22].mxu0 }
 0x2d8   : > { %v2315_v21 = vadd.f32 %v2314_v18, %v2313_v16  ;;  %v2316_v43 = vpop.f32.mrb[22].mxu1  ;;  %v2253_v24 = vpop.f32.mrb[23].mxu0 }
 0x2d9   : > { %v2317_v25 = vpop.f32.mrb[23].mxu1  ;;  %v1424_v27 = vadd.f32 %v2251_v19, %v3326_v51  ;;  %v2254_v14 = vadd.f32 %v2253_v24, %v2252_v22 }
 0x2da   : > { %v2318_v30 = vadd.f32 %v2317_v25, %v2316_v43 }
 0x2db   : > { %v1427_v31 = vadd.f32 %v2254_v14, %v3326_v51  ;;  %v1521_v34 = vadd.f32 %v2315_v21, %v1424_v27 }
 0x2dd   : > { %v2255_v41 = vpop.f32.mrb[24].mxu0  ;;  %v1524_v60 = vadd.f32 %v2318_v30, %v1427_v31 }
 0x2de   : > { %v2319_v59 = vpop.f32.mrb[24].mxu1  ;;  %v2256_v36 = vpop.f32.mrb[25].mxu0 }
 0x2df   : > { %v2320_v39 = vpop.f32.mrb[25].mxu1  ;;  %v2257_v26 = vadd.f32 %v2256_v36, %v2255_v41  ;;  %v2258_v40 = vpop.f32.mrb[26].mxu0 }
 0x2e0   : > { %v2321_v37 = vadd.f32 %v2320_v39, %v2319_v59  ;;  %v2322_v53 = vpop.f32.mrb[26].mxu1  ;;  %v2259_v44 = vpop.f32.mrb[27].mxu0 }
 0x2e1   : > { %v2323_v62 = vpop.f32.mrb[27].mxu1  ;;  %v1432_v61 = vadd.f32 %v2257_v26, %v3326_v51  ;;  %v2260_v38 = vadd.f32 %v2259_v44, %v2258_v40 }
 0x2e2   : > { %v2324_v45 = vadd.f32 %v2323_v62, %v2322_v53 }
 0x2e3   : > { %v1435_v49 = vadd.f32 %v2260_v38, %v3326_v51  ;;  %v1529_v47 = vadd.f32 %v2321_v37, %v1432_v61 }
 0x2e5   : > { %v2261_v50 = vpop.f32.mrb[28].mxu0  ;;  %v1532_v48 = vadd.f32 %v2324_v45, %v1435_v49 }
 0x2e6   : > { %v2325_v55 = vpop.f32.mrb[28].mxu1  ;;  %v2262_v2 = vpop.f32.mrb[29].mxu0 }
 0x2e7   : > { %v2326_v54 = vpop.f32.mrb[29].mxu1  ;;  %v2263_v29 = vadd.f32 %v2262_v2, %v2261_v50  ;;  %v2264_v8 = vpop.f32.mrb[30].mxu0 }
 0x2e8   : > { %v2327_v5 = vadd.f32 %v2326_v54, %v2325_v55  ;;  %v2328_v32 = vpop.f32.mrb[30].mxu1  ;;  %v2265_v58 = vpop.f32.mrb[31].mxu0 }
 0x2e9   : > { %v2329_v35 = vpop.f32.mrb[31].mxu1  ;;  %v1440_v0 = vadd.f32 %v2263_v29, %v3326_v51  ;;  %v2266_v1 = vadd.f32 %v2265_v58, %v2264_v8 }
 0x2ea   : > { %v2330_v3 = vadd.f32 %v2329_v35, %v2328_v32 }
 0x2eb   : > { %v1443_v4 = vadd.f32 %v2266_v1, %v3326_v51  ;;  %v1537_v20 = vadd.f32 %v2327_v5, %v1440_v0 }
 0x2ed   : > { %v2397_v11 = vpop.f32.mrb[32].mxu0  ;;  %v1540_v7 = vadd.f32 %v2330_v3, %v1443_v4 }
 0x2ee   : > { %v2405_v6 = vpop.f32.mrb[32].mxu1  ;;  %v1586_v9 = vadd.f32 %v2397_v11, %v3336_v28  ;;  %v1577_v57 = vpop.f32.mrb[33].mxu0 }
 0x2ef   : > { %v1618_v10 = vadd.f32 %v2405_v6, %v1521_v34  ;;  %v1609_v15 = vpop.f32.mrb[33].mxu1  ;;  %v1578_v16 = vadd.f32 %v1577_v57, %v3330_v52  ;;  %v2398_v18 = vpop.f32.mrb[34].mxu0 }
 0x2f0   : > { %v1610_v17 = vadd.f32 %v1609_v15, %v1513_v12  ;;  %v2406_v19 = vpop.f32.mrb[34].mxu1  ;;  %v1589_v21 = vadd.f32 %v2398_v18, %v3338_v33  ;;  %v1580_v43 = vpop.f32.mrb[35].mxu0  ;;  %1644 = vmax.xlane.f32.xlu1 %v1586_v9 }
 0x2f1   : > { %v1621_v22 = vadd.f32 %v2406_v19, %v1524_v60  ;;  %v1612_v24 = vpop.f32.mrb[35].mxu1  ;;  %1660 = vmax.xlane.f32.xlu0 %v1618_v10  ;;  %v1581_v51 = vadd.f32 %v1580_v43, %v3332_v13 }
 0x2f2   : > { %v1613_v25 = vadd.f32 %v1612_v24, %v3354_v56 }
 0x2f4   : > { %1646 = vmax.xlane.f32.xlu1 %v1589_v21 }
 0x2f5   : > { %1640 = vmax.xlane.f32.xlu0 %v1578_v16  ;;  %v2401_v28 = vpop.f32.mrb[36].mxu0 }
 0x2f6   : > { %v2409_v27 = vpop.f32.mrb[36].mxu1  ;;  %v1602_v52 = vadd.f32 %v2401_v28, %v3348_v42  ;;  %v1593_v14 = vpop.f32.mrb[37].mxu0 }
 0x2f7   : > { %v3368_v12 = vadd.f32 %v2409_v27, %v1537_v20  ;;  %v1625_v30 = vpop.f32.mrb[37].mxu1  ;;  %v3371_v33 = vadd.f32 %v1593_v14, %v3342_v63  ;;  %v2402_v34 = vpop.f32.mrb[38].mxu0 }
 0x2f8   : > { %v3373_v31 = vadd.f32 %v1625_v30, %v1529_v47  ;;  %v2410_v41 = vpop.f32.mrb[38].mxu1  ;;  %v1605_v13 = vadd.f32 %v2402_v34, %v3350_v23  ;;  %v1596_v59 = vpop.f32.mrb[39].mxu0  ;;  %1662 = vmax.xlane.f32.xlu1 %v1621_v22 }
 0x2f9   : > { %v3376_v56 = vadd.f32 %v2410_v41, %v1540_v7  ;;  %v1628_v60 = vpop.f32.mrb[39].mxu1  ;;  %1656 = vmax.xlane.f32.xlu0 %v1610_v17  ;;  %v1597_v42 = vadd.f32 %v1596_v59, %v3344_v46 }
 0x2fa   : > { %v3379_v36 = vadd.f32 %v1628_v60, %v1532_v48 }
 0x2fc   : > { %1658 = vmax.xlane.f32.xlu1 %v1613_v25 }
 0x2fd   : > { %1642 = vmax.xlane.f32.xlu0 %v1581_v51 }
 0x300   : > { %1654 = vmax.xlane.f32.xlu1 %v1605_v13 }
 0x301   : > { %1652 = vmax.xlane.f32.xlu0 %v1602_v52 }
 0x304   : > { %1650 = vmax.xlane.f32.xlu1 %v1597_v42 }
 0x305   : > { %1648 = vmax.xlane.f32.xlu0 %v3371_v33 }
 0x308   : > { %1666 = vmax.xlane.f32.xlu1 %v3379_v36 }
 0x309   : > { %1664 = vmax.xlane.f32.xlu0 %v3373_v31 }
 0x30c   : > { %1670 = vmax.xlane.f32.xlu1 %v3376_v56 }
 0x30d   : > { %1668 = vmax.xlane.f32.xlu0 %v3368_v12 }
 0x37d   : > { %v1645_v23 = vpop.xlane.xlu1 %1644 }
 0x37e   : > { %v1661_v63 = vpop.xlane.xlu0 %1660  ;;  %v3386_v46 = vsub.f32 %v1586_v9, %v1645_v23 }
 0x37f   : > { %v3388_v39 = vsub.f32 %v1618_v10, %v1661_v63 }
 0x380   : > { %v1692_v26 = vmul.f32 1.442695, %v3386_v46 }
 0x381   : > { %v1647_v37 = vpop.xlane.xlu1 %1646  ;;  %v1708_v44 = vmul.f32 1.442695, %v3388_v39 }
 0x382   : > { %v1641_v40 = vpop.xlane.xlu0 %1640  ;;  %v3391_v53 = vsub.f32 %v1589_v21, %v1647_v37  ;;  %2581 = vpow2.f32 %v1692_v26 }
 0x383   : > { %v3394_v62 = vsub.f32 %v1578_v16, %v1641_v40 }
 0x384   : > { %v1694_v61 = vmul.f32 1.442695, %v3391_v53 }
 0x385   : > { %v1663_v38 = vpop.xlane.xlu1 %1662  ;;  %v1688_v50 = vmul.f32 1.442695, %v3394_v62 }
 0x386   : > { %v1657_v45 = vpop.xlane.xlu0 %1656  ;;  %2583 = vpow2.f32 %v1694_v61  ;;  %v3397_v49 = vsub.f32 %v1621_v22, %v1663_v38 }
 0x387   : > { %v3399_v47 = vsub.f32 %v1610_v17, %v1657_v45  ;;  %2585 = vpow2.f32 %v1708_v44 }
 0x388   : > { %v1710_v55 = vmul.f32 1.442695, %v3397_v49 }
 0x389   : > { %v1659_v48 = vpop.xlane.xlu1 %1658  ;;  %v1704_v54 = vmul.f32 1.442695, %v3399_v47 }
 0x38a   : > { %v1643_v2 = vpop.xlane.xlu0 %1642  ;;  %2587 = vpow2.f32 %v1710_v55  ;;  %v3404_v29 = vsub.f32 %v1613_v25, %v1659_v48 }
 0x38b   : > { %v3406_v5 = vsub.f32 %v1581_v51, %v1643_v2  ;;  %2589 = vpow2.f32 %v1688_v50 }
 0x38c   : > { %v2582_v32 = vpop.eup %2581  ;;  %2591 = vpow2.f32 %v1704_v54  ;;  %v1706_v0 = vmul.f32 1.442695, %v3404_v29 }
 0x38d   : > { %v1690_v8 = vmul.f32 1.442695, %v3406_v5  ;;  %v1655_v58 = vpop.xlane.xlu1 %1654  ;;  %1724 = vadd.xlane.f32.xlu0 %v2582_v32 }
 0x38e   : > { %v1653_v35 = vpop.xlane.xlu0 %1652  ;;  %v3410_v1 = vsub.f32 %v1605_v13, %v1655_v58 }
 0x38f   : > { %v3412_v3 = vsub.f32 %v1602_v52, %v1653_v35  ;;  %2593 = vpow2.f32 %v1690_v8 }
 0x390   : > { %v2584_v4 = vpop.eup %2583  ;;  %2595 = vpow2.f32 %v1706_v0  ;;  %v1702_v9 = vmul.f32 1.442695, %v3410_v1 }
 0x391   : > { %v1700_v20 = vmul.f32 1.442695, %v3412_v3  ;;  %v2586_v11 = vpop.eup %2585  ;;  %1726 = vadd.xlane.f32.xlu1 %v2584_v4  ;;  %v1651_v6 = vpop.xlane.xlu1 %1650 }
 0x392   : > { %v1649_v7 = vpop.xlane.xlu0 %1648  ;;  %v3416_v10 = vsub.f32 %v1597_v42, %v1651_v6  ;;  %1740 = vadd.xlane.f32.xlu0 %v2586_v11 }
 0x393   : > { %v3419_v57 = vsub.f32 %v3371_v33, %v1649_v7  ;;  %2597 = vpow2.f32 %v1700_v20 }
 0x394   : > { %v2588_v15 = vpop.eup %2587  ;;  %2599 = vpow2.f32 %v1702_v9  ;;  %v1698_v21 = vmul.f32 1.442695, %v3416_v10 }
 0x395   : > { %v1696_v16 = vmul.f32 1.442695, %v3419_v57  ;;  %v2590_v17 = vpop.eup %2589  ;;  %1742 = vadd.xlane.f32.xlu1 %v2588_v15  ;;  %v1667_v18 = vpop.xlane.xlu1 %1666 }
 0x396   : > { %v1665_v19 = vpop.xlane.xlu0 %1664  ;;  %v3424_v22 = vsub.f32 %v3379_v36, %v1667_v18  ;;  %1720 = vadd.xlane.f32.xlu0 %v2590_v17  ;;  %v2592_v24 = vpop.eup %2591 }
 0x397   : > { %v3427_v43 = vsub.f32 %v3373_v31, %v1665_v19  ;;  %2601 = vpow2.f32 %v1696_v16 }
 0x398   : > { %2603 = vpow2.f32 %v1698_v21  ;;  %v1714_v52 = vmul.f32 1.442695, %v3424_v22 }
 0x399   : > { %v1712_v51 = vmul.f32 1.442695, %v3427_v43  ;;  %v2594_v25 = vpop.eup %2593  ;;  %v1671_v28 = vpop.xlane.xlu1 %1670 }
 0x39a   : > { %v1669_v27 = vpop.xlane.xlu0 %1668  ;;  %1736 = vadd.xlane.f32.xlu0 %v2592_v24  ;;  %1722 = vadd.xlane.f32.xlu1 %v2594_v25  ;;  %v3435_v30 = vsub.f32 %v3376_v56, %v1671_v28  ;;  %v2596_v33 = vpop.eup %2595 }
 0x39b   : > { %v3432_v14 = vsub.f32 %v3368_v12, %v1669_v27  ;;  %2605 = vpow2.f32 %v1712_v51 }
 0x39c   : > { %2607 = vpow2.f32 %v1714_v52  ;;  %v1718_v41 = vmul.f32 1.442695, %v3435_v30 }
 0x39d   : > { %v1716_v31 = vmul.f32 1.442695, %v3432_v14  ;;  %v2598_v34 = vpop.eup %2597 }
 0x39e   : > { %1738 = vadd.xlane.f32.xlu1 %v2596_v33  ;;  %1732 = vadd.xlane.f32.xlu0 %v2598_v34  ;;  %v2600_v13 = vpop.eup %2599 }
 0x39f   : > { %2609 = vpow2.f32 %v1716_v31 }
 0x3a0   : > { %2611 = vpow2.f32 %v1718_v41 }
 0x3a1   : > { %v2602_v59 = vpop.eup %2601 }
 0x3a2   : > { %1734 = vadd.xlane.f32.xlu1 %v2600_v13  ;;  %1728 = vadd.xlane.f32.xlu0 %v2602_v59  ;;  %v2604_v12 = vpop.eup %2603 }
 0x3a5   : > { %v2606_v60 = vpop.eup %2605 }
 0x3a6   : > { %1730 = vadd.xlane.f32.xlu1 %v2604_v12  ;;  %1744 = vadd.xlane.f32.xlu0 %v2606_v60  ;;  %v2608_v56 = vpop.eup %2607 }
 0x3a9   : > { %v2610_v42 = vpop.eup %2609 }
 0x3aa   : > { %1746 = vadd.xlane.f32.xlu1 %v2608_v56  ;;  %1748 = vadd.xlane.f32.xlu0 %v2610_v42  ;;  %v2612_v36 = vpop.eup %2611 }
 0x3ae   : > { %1750 = vadd.xlane.f32.xlu1 %v2612_v36 }
 0x41a   : > { %v1725_v63 = vpop.xlane.xlu0 %1724 }
 0x41b   : > { %2613 = vlog2.f32 %v1725_v63 }
 0x41e   : > { %v1727_v23 = vpop.xlane.xlu1 %1726 }
 0x41f   : > { %2615 = vlog2.f32 %v1727_v23  ;;  %v1741_v26 = vpop.xlane.xlu0 %1740 }
 0x420   : > { %2617 = vlog2.f32 %v1741_v26 }
 0x422   : > { %v1743_v37 = vpop.xlane.xlu1 %1742 }
 0x423   : > { %2619 = vlog2.f32 %v1743_v37  ;;  %v1721_v40 = vpop.xlane.xlu0 %1720 }
 0x424   : > { %2621 = vlog2.f32 %v1721_v40 }
 0x425   : > { %v2614_v44 = vpop.eup %2613 }
 0x426   : > { %v1757_v61 = vmul.f32 0.6931472, %v2614_v44 }
 0x427   : > { %v1723_v38 = vpop.xlane.xlu1 %1722  ;;  %v1737_v45 = vpop.xlane.xlu0 %1736 }
 0x428   : > { %2623 = vlog2.f32 %v1723_v38  ;;  %v1786_v55 = vsub.f32 %v3386_v46, %v1757_v61 }
 0x429   : > { %v2616_v50 = vpop.eup %2615  ;;  %2625 = vlog2.f32 %v1737_v45 }
 0x42a   : > { %v2618_v48 = vpop.eup %2617  ;;  %v1759_v2 = vmul.f32 0.6931472, %v2616_v50  ;;  %1802 = vst [vmem:[%s3133_s29 + $0x10] sm:$0xff] %v1786_v55 }
 0x42b   : > { %v1773_v54 = vmul.f32 0.6931472, %v2618_v48  ;;  %v1739_v8 = vpop.xlane.xlu1 %1738  ;;  %v1733_v32 = vpop.xlane.xlu0 %1732 }
 0x42c   : > { %v1787_v58 = vsub.f32 %v3391_v53, %v1759_v2  ;;  %2627 = vlog2.f32 %v1739_v8 }
 0x42d   : > { %v2620_v35 = vpop.eup %2619  ;;  %v1794_v0 = vsub.f32 %v3388_v39, %v1773_v54  ;;  %2629 = vlog2.f32 %v1733_v32 }
 0x42e   : > { %v2622_v4 = vpop.eup %2621  ;;  %1803 = vst [vmem:[%s3133_s29 + $0x18] sm:$0xff] %v1787_v58  ;;  %v1775_v46 = vmul.f32 0.6931472, %v2620_v35 }
 0x42f   : > { %1810 = vst [vmem:[%s3133_s29 + $0x50] sm:$0xff] %v1794_v0  ;;  %v1753_v20 = vmul.f32 0.6931472, %v2622_v4  ;;  %v1735_v11 = vpop.xlane.xlu1 %1734  ;;  %v1729_v6 = vpop.xlane.xlu0 %1728 }
 0x430   : > { %v1795_v7 = vsub.f32 %v3397_v49, %v1775_v46  ;;  %2631 = vlog2.f32 %v1735_v11 }
 0x431   : > { %v1784_v9 = vsub.f32 %v3394_v62, %v1753_v20  ;;  %2633 = vlog2.f32 %v1729_v6 }
 0x432   : > { %v2624_v53 = vpop.eup %2623  ;;  %1811 = vst [vmem:[%s3133_s29 + $0x58] sm:$0xff] %v1795_v7 }
 0x433   : > { %v2626_v15 = vpop.eup %2625  ;;  %1800 = vst [vmem:[%s3133_s29] sm:$0xff] %v1784_v9  ;;  %v1755_v39 = vmul.f32 0.6931472, %v2624_v53  ;;  %v1731_v16 = vpop.xlane.xlu1 %1730 }
 0x434   : > { %v1745_v17 = vpop.xlane.xlu0 %1744  ;;  %v1769_v18 = vmul.f32 0.6931472, %v2626_v15  ;;  %2635 = vlog2.f32 %v1731_v16 }
 0x435   : > { %v1785_v19 = vsub.f32 %v3406_v5, %v1755_v39  ;;  %2637 = vlog2.f32 %v1745_v17 }
 0x436   : > { %v2628_v49 = vpop.eup %2627  ;;  %v1792_v21 = vsub.f32 %v3399_v47, %v1769_v18 }
 0x437   : > { %v2630_v62 = vpop.eup %2629  ;;  %1801 = vst [vmem:[%s3133_s29 + $0x8] sm:$0xff] %v1785_v19  ;;  %v1771_v24 = vmul.f32 0.6931472, %v2628_v49  ;;  %v1747_v51 = vpop.xlane.xlu1 %1746 }
 0x438   : > { %v1749_v25 = vpop.xlane.xlu0 %1748  ;;  %1808 = vst [vmem:[%s3133_s29 + $0x40] sm:$0xff] %v1792_v21  ;;  %v1765_v28 = vmul.f32 0.6931472, %v2630_v62  ;;  %2639 = vlog2.f32 %v1747_v51 }
 0x439   : > { %v1793_v27 = vsub.f32 %v3404_v29, %v1771_v24  ;;  %2641 = vlog2.f32 %v1749_v25 }
 0x43a   : > { %v2632_v5 = vpop.eup %2631  ;;  %v1790_v52 = vsub.f32 %v3412_v3, %v1765_v28 }
 0x43b   : > { %v2634_v33 = vpop.eup %2633  ;;  %1809 = vst [vmem:[%s3133_s29 + $0x48] sm:$0xff] %v1793_v27  ;;  %v1767_v47 = vmul.f32 0.6931472, %v2632_v5  ;;  %v1751_v31 = vpop.xlane.xlu1 %1750 }
 0x43c   : > { %1806 = vst [vmem:[%s3133_s29 + $0x30] sm:$0xff] %v1790_v52  ;;  %v1761_v34 = vmul.f32 0.6931472, %v2634_v33  ;;  %2643 = vlog2.f32 %v1751_v31 }
 0x43d   : > { %v1791_v41 = vsub.f32 %v3410_v1, %v1767_v47 }
 0x43e   : > { %v2636_v13 = vpop.eup %2635  ;;  %v1788_v59 = vsub.f32 %v3419_v57, %v1761_v34 }
 0x43f   : > { %v2638_v29 = vpop.eup %2637  ;;  %1807 = vst [vmem:[%s3133_s29 + $0x38] sm:$0xff] %v1791_v41  ;;  %v1763_v12 = vmul.f32 0.6931472, %v2636_v13 }
 0x440   : > { %1804 = vst [vmem:[%s3133_s29 + $0x20] sm:$0xff] %v1788_v59  ;;  %v1777_v3 = vmul.f32 0.6931472, %v2638_v29 }
 0x441   : > { %v1789_v60 = vsub.f32 %v3416_v10, %v1763_v12 }
 0x442   : > { %v2640_v56 = vpop.eup %2639  ;;  %v1796_v42 = vsub.f32 %v3427_v43, %v1777_v3 }
 0x443   : > { %v2642_v36 = vpop.eup %2641  ;;  %1805 = vst [vmem:[%s3133_s29 + $0x28] sm:$0xff] %v1789_v60  ;;  %v1779_v63 = vmul.f32 0.6931472, %v2640_v56 }
 0x444   : > { %1812 = vst [vmem:[%s3133_s29 + $0x60] sm:$0xff] %v1796_v42  ;;  %v1781_v1 = vmul.f32 0.6931472, %v2642_v36 }
 0x445   : > { %v1797_v57 = vsub.f32 %v3424_v22, %v1779_v63 }
 0x446   : > { %v2644_v23 = vpop.eup %2643  ;;  %v1798_v26 = vsub.f32 %v3432_v14, %v1781_v1 }
 0x447   : > { %1813 = vst [vmem:[%s3133_s29 + $0x68] sm:$0xff] %v1797_v57  ;;  %v1783_v37 = vmul.f32 0.6931472, %v2644_v23 }
 0x448   : > { %1814 = vst [vmem:[%s3133_s29 + $0x70] sm:$0xff] %v1798_v26 }
 0x449   : > { %v1799_v40 = vsub.f32 %v3435_v30, %v1783_v37 }
 0x44b   : > { %1815 = vst [vmem:[%s3133_s29 + $0x78] sm:$0xff] %v1799_v40 }
 0x44c PF: > { %s2058_s5 = sshll.u32 %s2787_s15, 11  ;;  %s1830_s9 = sshll.u32 %s3133_s29, 4  ;;  %s3478_s9 = int_to_ptr.vmem [resolvable:$true] %s1830_s9 }
 0x44d   : > { %s3475_s7 = scalar_lea.hbm %s3537_s3, %s2058_s5  ;;  %s3482_s6 = scalar_lea.sflag [#allocation5], %s188_s8 }
 0x44e   : > { %s2701_s30 = scalar_lea.vmem %s3478_s9, 2048  ;;  %p3612_p11 = scmp.ne.s32.totalorder %s3566_s26, 0 }
 0x44f   : > { %p2702_p8 = scmp.ne.s32.totalorder %s3478_s9, %s2701_s30  ;;  %s2811_s15 = smov [#allocation8]  }
 0x450   : > { %s2705_s10 = sshll.u32 %s2811_s15, 4  ;;  %s2706_s10 = int_to_ptr.vmem [resolvable:$false] %s2705_s10 }
 0x451   : > { %p2703_p12 = pnand %p2702_p8, %p3612_p11  ;;  %s2707_s11 = scalar_lea.vmem %s2706_s10, 4096 }
 0x452   : > { %p2708_p5 = scmp.lt.s32.totalorder %s3478_s9, %s2706_s10  ;;  %p2709_p6 = scmp.lt.s32.totalorder %s2707_s11, %s2701_s30 }
 0x453   : > { %p2704_p4 = pneg %p2703_p12 }
 0x454   : > { %p2710_p7 = por %p2709_p6, %p2708_p5 }
 0x456   : > { %p2711_p9 = pnand %p2710_p7, %p2704_p4 }
 0x458   : > { %2714 = shalt.err (!%p2711_p9)
}
 0x459   : > { %s2715_s8 = scalar_lea.hbm %s3475_s7, 2048  ;;  %s2719_s21 = scalar_lea.hbm %s3537_s3, 10240 }
 0x45a   : > { %p2716_p10 = scmp.ne.s32.totalorder %s3475_s7, %s2715_s8  ;;  %p2720_p2 = scmp.lt.u32.totalorder %s3475_s7, %s3537_s3 }
 0x45b   : > { %p2721_p0 = scmp.lt.u32.totalorder %s2719_s21, %s2715_s8  ;;  %p2723_p8 = scmp.lt.u32.totalorder %s2715_s8, %s3475_s7 }
 0x45c   : > { %p2717_p13 = pnand %p2716_p10, %p3612_p11 }
 0x45d   : > { %p2722_p3 = por %p2721_p0, %p2720_p2 }
 0x45e   : > { %p2718_p1 = pneg %p2717_p13 }
 0x45f   : > { %p2724_p12 = por %p2723_p8, %p2722_p3 }
 0x461   : > { %p2725_p4 = pnand %p2724_p12, %p2718_p1 }
 0x463   : > { %2728 = shalt.err (!%p2725_p4)
}
 0x464   : > { %s2812_s16 = smov 128   ;;  %s2813_s4 = smov 8  }
 0x465   : > { %2451 = dma.vmem_to_hbm [thread:$0]  (%p3612_p11), %s3478_s9, 2048, %s3475_s7, %s3482_s6, %s2812_s16, %s2812_s16, %s2813_s4  }
 0x466 PF: > { %p2468_p5 = scmp.ge.s32.totalorder %s2803_s19, 2  ;;  %s1845_s5 = sand.u32 1, %s2775_s12  }
 0x467   : > { %p3613_p6 = scmp.ne.s32.totalorder %s3568_s28, 0  ;;  %s1846_s22 = scalar_lea.sflag [#allocation5], %s1845_s5 }
 0x469   : > { %p2461_p7 = pnand %p2468_p5, %p3613_p6 }
 0x46b   : > { %2770 = dma.done.wait (!%p2461_p7), %s1846_s22, 2048  }
 0x46c   : > { %2772 = vsyncadd (!%p2461_p7), %s1846_s22, 4294965248  ;;  %s18_s19 = sadd.s32 1, %s2803_s19   ;;  %s3614_s26 = sld [smem:[#allocation12_spill]] }
 0x46d   : > { %p15_p9 = scmp.ge.s32.totalorder %s18_s19, 12   ;;  %s3615_s23 = sld [smem:[#allocation13_spill]] }
 0x46e   : > { %s3616_s12 = smov %s2779_s13  ;;  %s3617_s13 = smov %s2783_s14 }
 0x46f   : > { %s3618_s14 = smov %s2895_s27  ;;  %s3619_s15 = smov %s2795_s17 }
 0x470   : > { %s3620_s16 = smov %s2799_s18  ;;  %17 = sbr.rel (!%p15_p9) target bundleno = 7 (0x7), region = 83 }
 0x472   : > { %s3621_s17 = smov %s3614_s26 }
 0x473   : > { %s3622_s18 = smov %s3615_s23 }
 0x477   :  { %1851 = vsyncpa [#allocation4], 1 }
 0x478   :  { %1853 = vsyncpa [#allocation4 + $0x1], 1 }
 0x479   :  { %1854 = vsyncpa [#allocation7], 1 }
 0x47a   :  { %1855 = vsyncpa [#allocation5], 1 }
 0x47b   :  { %1857 = vsyncpa [#allocation5 + $0x1], 1 }

</bundles_post_ra>
